<compile_context>
chip_gen: v6e
topology: v6e:2x2x1
jax: 0.10.0
libtpu: 0.0.40
codegen_flags: <defaults>
</compile_context>

<pallas_src>
import jax
import jax.numpy as jnp
from jax.experimental import pallas as pl
from jax.experimental.pallas import tpu as pltpu


def _round_up(x, m):
    return (x + m - 1) // m * m


def _gather_concat_score_kernel(h_ref, r_ref, ent_ref, rel_ref,
                                stack_ref, pred_ref):
    """One grid step processes TB batch rows.

    h_ref/r_ref : SMEM (B_pad,) int32, scalar-prefetched lookup indices
    ent_ref     : (num_ent, D) f32 VMEM-resident entity table
    rel_ref     : (num_rel, D) f32 VMEM-resident relation table
    stack_ref   : (TB, 2*D) VMEM output block -- flat [E[h] | R[r]] per row
    pred_ref    : (TB, 2*D) VMEM output block -- sigmoid(stack)
    """
    tb = stack_ref.shape[0]
    d = ent_ref.shape[1]
    base = pl.program_id(0) * tb

    # Row gather via dynamic VMEM loads, written directly into the lane-dense
    # output slab (no DMAs, no VMEM->VMEM staging copies).  Static Python loop:
    # tb is a compile-time constant, so this fully unrolls for the scheduler.
    for i in range(tb):
        h = h_ref[base + i]
        r = r_ref[base + i]
        stack_ref[pl.ds(i, 1), pl.ds(0, d)] = ent_ref[pl.ds(h, 1), :]
        stack_ref[pl.ds(i, 1), pl.ds(d, d)] = rel_ref[pl.ds(r, 1), :]

    # score() with params.loss == 'bce': one full-tile sigmoid (EUP) + store.
    pred_ref[...] = jax.nn.sigmoid(stack_ref[...])


def base_model_forward(h_idx, r_idx, ent_table, rel_table, k_h, k_w,
                       *, block_b=32):
    """h_idx, r_idx: (B,) int; ent_table: (num_ent, D); rel_table: (num_rel, D)
    with D == k_h * k_w (required by concat form 'plain').

    Returns (stack_inp, pred) with stack_inp of shape (B, 1, 2*k_h, k_w) (NCHW)
    and pred = sigmoid(stack_inp)  (the 'bce' score)."""
    B = h_idx.shape[0]
    D = k_h * k_w
    assert ent_table.shape[1] == D and rel_table.shape[1] == D

    num_ent = ent_table.shape[0]
    num_rel = rel_table.shape[0]

    # Block of TB rows per grid step (TB a multiple of 8 for sublane alignment).
    tb = _round_up(min(block_b, B), 8)
    b_pad = _round_up(B, tb)
    nb = b_pad // tb

    # Pad the index vectors; padded rows gather row 0 (discarded afterwards).
    h_pad = jnp.zeros((b_pad,), jnp.int32).at[:B].set(h_idx.astype(jnp.int32))
    r_pad = jnp.zeros((b_pad,), jnp.int32).at[:B].set(r_idx.astype(jnp.int32))

    ent_table = ent_table.astype(jnp.float32)
    rel_table = rel_table.astype(jnp.float32)

    grid_spec = pltpu.PrefetchScalarGridSpec(
        num_scalar_prefetch=2,
        grid=(nb,),
        in_specs=[
            # Whole table VMEM-resident; same block index for every grid step.
            pl.BlockSpec((num_ent, D), lambda j, h, r: (0, 0)),
            pl.BlockSpec((num_rel, D), lambda j, h, r: (0, 0)),
        ],
        out_specs=[
            pl.BlockSpec((tb, 2 * D), lambda j, h, r: (j, 0)),
            pl.BlockSpec((tb, 2 * D), lambda j, h, r: (j, 0)),
        ],
    )

    table_bytes = (num_ent * D + num_rel * D) * 4
    out_bytes = 2 * b_pad * 2 * D * 4
    cost = pl.CostEstimate(
        flops=2 * b_pad * 2 * D,            # sigmoid arithmetic (cheap)
        transcendentals=b_pad * 2 * D,      # one exp per output element
        bytes_accessed=table_bytes + out_bytes + 2 * b_pad * 4,
    )

    stack_flat, pred_flat = pl.pallas_call(
        _gather_concat_score_kernel,
        grid_spec=grid_spec,
        out_shape=(
            jax.ShapeDtypeStruct((b_pad, 2 * D), jnp.float32),
            jax.ShapeDtypeStruct((b_pad, 2 * D), jnp.float32),
        ),
        compiler_params=pltpu.CompilerParams(
            dimension_semantics=("parallel",),
            # Tiny footprint here (<1 MiB); explicit limit is safe on
            # v5e (16 MiB scoped default) as well as v6e/v7x.
            vmem_limit_bytes=32 * 1024 * 1024,
        ),
        cost_estimate=cost,
    )(h_pad, r_pad, ent_table, rel_table)

    # Flat row = [E[h] (D) | R[r] (D)]; row-major reshape reproduces
    # torch.cat([e1.view(-1,1,kh,kw), rel.view(-1,1,kh,kw)], dim=2) exactly.
    stack = stack_flat[:B].reshape(B, 1, 2 * k_h, k_w)
    pred = pred_flat[:B].reshape(B, 1, 2 * k_h, k_w)
    return stack, pred


if __name__ == "__main__":
    # ---- deterministic synthetic "params" / weights ----
    num_ent, num_rel = 500, 50
    k_h, k_w = 8, 16
    D = k_h * k_w                 # 128 -> flat concat row is 256 lanes wide
    B = 64

    key = jax.random.PRNGKey(0)
    k_ent, k_rel, k_h_idx, k_r_idx = jax.random.split(key, 4)

    # xavier_normal_-style init: std = sqrt(2 / (fan_in + fan_out))
    ent_std = (2.0 / (num_ent + D)) ** 0.5
    rel_std = (2.0 / (num_rel + D)) ** 0.5
    ent_table = ent_std * jax.random.normal(k_ent, (num_ent, D), jnp.float32)
    rel_table = rel_std * jax.random.normal(k_rel, (num_rel, D), jnp.float32)

    h_idx = jax.random.randint(k_h_idx, (B,), 0, num_ent, dtype=jnp.int32)
    r_idx = jax.random.randint(k_r_idx, (B,), 0, num_rel, dtype=jnp.int32)

    stack, pred = base_model_forward(h_idx, r_idx, ent_table, rel_table,
                                     k_h, k_w, block_b=32)
    jax.block_until_ready((stack, pred))

    # pure-JAX reference of concat('plain') + score('bce')
    e1 = ent_table[h_idx].reshape(B, 1, k_h, k_w)
    rr = rel_table[r_idx].reshape(B, 1, k_h, k_w)
    ref_stack = jnp.concatenate([e1, rr], axis=2)
    ref_pred = jax.nn.sigmoid(ref_stack)

    assert stack.shape == (B, 1, 2 * k_h, k_w)
    assert pred.shape == (B, 1, 2 * k_h, k_w)
    assert jnp.allclose(stack, ref_stack, atol=1e-6)
    assert jnp.allclose(pred, ref_pred, atol=1e-6)
    print("KERNEL_OK")
</pallas_src>

<mosaic_0001>
module attributes {stable_mosaic.version = 11 : i64} {
  func.func @_gather_concat_score_kernel(%arg0: i32, %arg1: memref<64xi32, #tpu.memory_space<smem>>, %arg2: memref<64xi32, #tpu.memory_space<smem>>, %arg3: memref<500x128xf32, #tpu.memory_space<vmem>>, %arg4: memref<50x128xf32, #tpu.memory_space<vmem>>, %arg5: memref<32x256xf32, #tpu.memory_space<vmem>>, %arg6: memref<32x256xf32, #tpu.memory_space<vmem>>) attributes {dimension_semantics = [#tpu.dimension_semantics<parallel>], iteration_bounds = array<i64: 2>, scalar_prefetch = 2 : i64, scratch_operands = 0 : i64, tpu.core_type = #tpu.core_type<tc>, window_params = [{pipeline_mode = #tpu.pipeline_mode<synchronous>, transform_indices = @transform_0, window_bounds = array<i64: 500, 128>}, {pipeline_mode = #tpu.pipeline_mode<synchronous>, transform_indices = @transform_1, window_bounds = array<i64: 50, 128>}, {transform_indices = @transform_2, window_bounds = array<i64: 32, 256>}, {transform_indices = @transform_3, window_bounds = array<i64: 32, 256>}]} {
    %c32_i32 = arith.constant 32 : i32
    %0 = arith.muli %arg0, %c32_i32 : i32
    %c0_i32 = arith.constant 0 : i32
    %1 = arith.addi %0, %c0_i32 : i32
    %2 = arith.index_cast %1 : i32 to index
    %3 = memref.load %arg1[%2] : memref<64xi32, #tpu.memory_space<smem>>
    %c0_i32_0 = arith.constant 0 : i32
    %4 = arith.addi %0, %c0_i32_0 : i32
    %5 = arith.index_cast %4 : i32 to index
    %6 = memref.load %arg2[%5] : memref<64xi32, #tpu.memory_space<smem>>
    %7 = arith.index_cast %3 : i32 to index
    %c0 = arith.constant 0 : index
    %8 = vector.load %arg3[%7, %c0] : memref<500x128xf32, #tpu.memory_space<vmem>>, vector<1x128xf32>
    %c0_1 = arith.constant 0 : index
    %c0_2 = arith.constant 0 : index
    %9 = vector.load %arg5[%c0_1, %c0_2] : memref<32x256xf32, #tpu.memory_space<vmem>>, vector<1x128xf32>
    tpu.vector_store %arg5[%c0_1, %c0_2], %8 {strides = array<i32>} : memref<32x256xf32, #tpu.memory_space<vmem>>, vector<1x128xf32>,
    %10 = arith.index_cast %6 : i32 to index
    %c0_3 = arith.constant 0 : index
    %11 = vector.load %arg4[%10, %c0_3] : memref<50x128xf32, #tpu.memory_space<vmem>>, vector<1x128xf32>
    %c0_4 = arith.constant 0 : index
    %c128 = arith.constant 128 : index
    %12 = vector.load %arg5[%c0_4, %c128] : memref<32x256xf32, #tpu.memory_space<vmem>>, vector<1x128xf32>
    tpu.vector_store %arg5[%c0_4, %c128], %11 {strides = array<i32>} : memref<32x256xf32, #tpu.memory_space<vmem>>, vector<1x128xf32>,
    %c1_i32 = arith.constant 1 : i32
    %13 = arith.addi %0, %c1_i32 : i32
    %14 = arith.index_cast %13 : i32 to index
    %15 = memref.load %arg1[%14] : memref<64xi32, #tpu.memory_space<smem>>
    %c1_i32_5 = arith.constant 1 : i32
    %16 = arith.addi %0, %c1_i32_5 : i32
    %17 = arith.index_cast %16 : i32 to index
    %18 = memref.load %arg2[%17] : memref<64xi32, #tpu.memory_space<smem>>
    %19 = arith.index_cast %15 : i32 to index
    %c0_6 = arith.constant 0 : index
    %20 = vector.load %arg3[%19, %c0_6] : memref<500x128xf32, #tpu.memory_space<vmem>>, vector<1x128xf32>
    %c1 = arith.constant 1 : index
    %c0_7 = arith.constant 0 : index
    %21 = vector.load %arg5[%c1, %c0_7] : memref<32x256xf32, #tpu.memory_space<vmem>>, vector<1x128xf32>
    tpu.vector_store %arg5[%c1, %c0_7], %20 {strides = array<i32>} : memref<32x256xf32, #tpu.memory_space<vmem>>, vector<1x128xf32>,
    %22 = arith.index_cast %18 : i32 to index
    %c0_8 = arith.constant 0 : index
    %23 = vector.load %arg4[%22, %c0_8] : memref<50x128xf32, #tpu.memory_space<vmem>>, vector<1x128xf32>
    %c1_9 = arith.constant 1 : index
    %c128_10 = arith.constant 128 : index
    %24 = vector.load %arg5[%c1_9, %c128_10] : memref<32x256xf32, #tpu.memory_space<vmem>>, vector<1x128xf32>
    tpu.vector_store %arg5[%c1_9, %c128_10], %23 {strides = array<i32>} : memref<32x256xf32, #tpu.memory_space<vmem>>, vector<1x128xf32>,
    %c2_i32 = arith.constant 2 : i32
    %25 = arith.addi %0, %c2_i32 : i32
    %26 = arith.index_cast %25 : i32 to index
    %27 = memref.load %arg1[%26] : memref<64xi32, #tpu.memory_space<smem>>
    %c2_i32_11 = arith.constant 2 : i32
    %28 = arith.addi %0, %c2_i32_11 : i32
    %29 = arith.index_cast %28 : i32 to index
    %30 = memref.load %arg2[%29] : memref<64xi32, #tpu.memory_space<smem>>
    %31 = arith.index_cast %27 : i32 to index
    %c0_12 = arith.constant 0 : index
    %32 = vector.load %arg3[%31, %c0_12] : memref<500x128xf32, #tpu.memory_space<vmem>>, vector<1x128xf32>
    %c2 = arith.constant 2 : index
    %c0_13 = arith.constant 0 : index
    %33 = vector.load %arg5[%c2, %c0_13] : memref<32x256xf32, #tpu.memory_space<vmem>>, vector<1x128xf32>
    tpu.vector_store %arg5[%c2, %c0_13], %32 {strides = array<i32>} : memref<32x256xf32, #tpu.memory_space<vmem>>, vector<1x128xf32>,
    %34 = arith.index_cast %30 : i32 to index
    %c0_14 = arith.constant 0 : index
    %35 = vector.load %arg4[%34, %c0_14] : memref<50x128xf32, #tpu.memory_space<vmem>>, vector<1x128xf32>
    %c2_15 = arith.constant 2 : index
    %c128_16 = arith.constant 128 : index
    %36 = vector.load %arg5[%c2_15, %c128_16] : memref<32x256xf32, #tpu.memory_space<vmem>>, vector<1x128xf32>
    tpu.vector_store %arg5[%c2_15, %c128_16], %35 {strides = array<i32>} : memref<32x256xf32, #tpu.memory_space<vmem>>, vector<1x128xf32>,
    %c3_i32 = arith.constant 3 : i32
    %37 = arith.addi %0, %c3_i32 : i32
    %38 = arith.index_cast %37 : i32 to index
    %39 = memref.load %arg1[%38] : memref<64xi32, #tpu.memory_space<smem>>
    %c3_i32_17 = arith.constant 3 : i32
    %40 = arith.addi %0, %c3_i32_17 : i32
    %41 = arith.index_cast %40 : i32 to index
    %42 = memref.load %arg2[%41] : memref<64xi32, #tpu.memory_space<smem>>
    %43 = arith.index_cast %39 : i32 to index
    %c0_18 = arith.constant 0 : index
    %44 = vector.load %arg3[%43, %c0_18] : memref<500x128xf32, #tpu.memory_space<vmem>>, vector<1x128xf32>
    %c3 = arith.constant 3 : index
    %c0_19 = arith.constant 0 : index
    %45 = vector.load %arg5[%c3, %c0_19] : memref<32x256xf32, #tpu.memory_space<vmem>>, vector<1x128xf32>
    tpu.vector_store %arg5[%c3, %c0_19], %44 {strides = array<i32>} : memref<32x256xf32, #tpu.memory_space<vmem>>, vector<1x128xf32>,
    %46 = arith.index_cast %42 : i32 to index
    %c0_20 = arith.constant 0 : index
    %47 = vector.load %arg4[%46, %c0_20] : memref<50x128xf32, #tpu.memory_space<vmem>>, vector<1x128xf32>
    %c3_21 = arith.constant 3 : index
    %c128_22 = arith.constant 128 : index
    %48 = vector.load %arg5[%c3_21, %c128_22] : memref<32x256xf32, #tpu.memory_space<vmem>>, vector<1x128xf32>
    tpu.vector_store %arg5[%c3_21, %c128_22], %47 {strides = array<i32>} : memref<32x256xf32, #tpu.memory_space<vmem>>, vector<1x128xf32>,
    %c4_i32 = arith.constant 4 : i32
    %49 = arith.addi %0, %c4_i32 : i32
    %50 = arith.index_cast %49 : i32 to index
    %51 = memref.load %arg1[%50] : memref<64xi32, #tpu.memory_space<smem>>
    %c4_i32_23 = arith.constant 4 : i32
    %52 = arith.addi %0, %c4_i32_23 : i32
    %53 = arith.index_cast %52 : i32 to index
    %54 = memref.load %arg2[%53] : memref<64xi32, #tpu.memory_space<smem>>
    %55 = arith.index_cast %51 : i32 to index
    %c0_24 = arith.constant 0 : index
    %56 = vector.load %arg3[%55, %c0_24] : memref<500x128xf32, #tpu.memory_space<vmem>>, vector<1x128xf32>
    %c4 = arith.constant 4 : index
    %c0_25 = arith.constant 0 : index
    %57 = vector.load %arg5[%c4, %c0_25] : memref<32x256xf32, #tpu.memory_space<vmem>>, vector<1x128xf32>
    tpu.vector_store %arg5[%c4, %c0_25], %56 {strides = array<i32>} : memref<32x256xf32, #tpu.memory_space<vmem>>, vector<1x128xf32>,
    %58 = arith.index_cast %54 : i32 to index
    %c0_26 = arith.constant 0 : index
    %59 = vector.load %arg4[%58, %c0_26] : memref<50x128xf32, #tpu.memory_space<vmem>>, vector<1x128xf32>
    %c4_27 = arith.constant 4 : index
    %c128_28 = arith.constant 128 : index
    %60 = vector.load %arg5[%c4_27, %c128_28] : memref<32x256xf32, #tpu.memory_space<vmem>>, vector<1x128xf32>
    tpu.vector_store %arg5[%c4_27, %c128_28], %59 {strides = array<i32>} : memref<32x256xf32, #tpu.memory_space<vmem>>, vector<1x128xf32>,
    %c5_i32 = arith.constant 5 : i32
    %61 = arith.addi %0, %c5_i32 : i32
    %62 = arith.index_cast %61 : i32 to index
    %63 = memref.load %arg1[%62] : memref<64xi32, #tpu.memory_space<smem>>
    %c5_i32_29 = arith.constant 5 : i32
    %64 = arith.addi %0, %c5_i32_29 : i32
    %65 = arith.index_cast %64 : i32 to index
    %66 = memref.load %arg2[%65] : memref<64xi32, #tpu.memory_space<smem>>
    %67 = arith.index_cast %63 : i32 to index
    %c0_30 = arith.constant 0 : index
    %68 = vector.load %arg3[%67, %c0_30] : memref<500x128xf32, #tpu.memory_space<vmem>>, vector<1x128xf32>
    %c5 = arith.constant 5 : index
    %c0_31 = arith.constant 0 : index
    %69 = vector.load %arg5[%c5, %c0_31] : memref<32x256xf32, #tpu.memory_space<vmem>>, vector<1x128xf32>
    tpu.vector_store %arg5[%c5, %c0_31], %68 {strides = array<i32>} : memref<32x256xf32, #tpu.memory_space<vmem>>, vector<1x128xf32>,
    %70 = arith.index_cast %66 : i32 to index
    %c0_32 = arith.constant 0 : index
    %71 = vector.load %arg4[%70, %c0_32] : memref<50x128xf32, #tpu.memory_space<vmem>>, vector<1x128xf32>
    %c5_33 = arith.constant 5 : index
    %c128_34 = arith.constant 128 : index
    %72 = vector.load %arg5[%c5_33, %c128_34] : memref<32x256xf32, #tpu.memory_space<vmem>>, vector<1x128xf32>
    tpu.vector_store %arg5[%c5_33, %c128_34], %71 {strides = array<i32>} : memref<32x256xf32, #tpu.memory_space<vmem>>, vector<1x128xf32>,
    %c6_i32 = arith.constant 6 : i32
    %73 = arith.addi %0, %c6_i32 : i32
    %74 = arith.index_cast %73 : i32 to index
    %75 = memref.load %arg1[%74] : memref<64xi32, #tpu.memory_space<smem>>
    %c6_i32_35 = arith.constant 6 : i32
    %76 = arith.addi %0, %c6_i32_35 : i32
    %77 = arith.index_cast %76 : i32 to index
    %78 = memref.load %arg2[%77] : memref<64xi32, #tpu.memory_space<smem>>
    %79 = arith.index_cast %75 : i32 to index
    %c0_36 = arith.constant 0 : index
    %80 = vector.load %arg3[%79, %c0_36] : memref<500x128xf32, #tpu.memory_space<vmem>>, vector<1x128xf32>
    %c6 = arith.constant 6 : index
    %c0_37 = arith.constant 0 : index
    %81 = vector.load %arg5[%c6, %c0_37] : memref<32x256xf32, #tpu.memory_space<vmem>>, vector<1x128xf32>
    tpu.vector_store %arg5[%c6, %c0_37], %80 {strides = array<i32>} : memref<32x256xf32, #tpu.memory_space<vmem>>, vector<1x128xf32>,
    %82 = arith.index_cast %78 : i32 to index
    %c0_38 = arith.constant 0 : index
    %83 = vector.load %arg4[%82, %c0_38] : memref<50x128xf32, #tpu.memory_space<vmem>>, vector<1x128xf32>
    %c6_39 = arith.constant 6 : index
    %c128_40 = arith.constant 128 : index
    %84 = vector.load %arg5[%c6_39, %c128_40] : memref<32x256xf32, #tpu.memory_space<vmem>>, vector<1x128xf32>
    tpu.vector_store %arg5[%c6_39, %c128_40], %83 {strides = array<i32>} : memref<32x256xf32, #tpu.memory_space<vmem>>, vector<1x128xf32>,
    %c7_i32 = arith.constant 7 : i32
    %85 = arith.addi %0, %c7_i32 : i32
    %86 = arith.index_cast %85 : i32 to index
    %87 = memref.load %arg1[%86] : memref<64xi32, #tpu.memory_space<smem>>
    %c7_i32_41 = arith.constant 7 : i32
    %88 = arith.addi %0, %c7_i32_41 : i32
    %89 = arith.index_cast %88 : i32 to index
    %90 = memref.load %arg2[%89] : memref<64xi32, #tpu.memory_space<smem>>
    %91 = arith.index_cast %87 : i32 to index
    %c0_42 = arith.constant 0 : index
    %92 = vector.load %arg3[%91, %c0_42] : memref<500x128xf32, #tpu.memory_space<vmem>>, vector<1x128xf32>
    %c7 = arith.constant 7 : index
    %c0_43 = arith.constant 0 : index
    %93 = vector.load %arg5[%c7, %c0_43] : memref<32x256xf32, #tpu.memory_space<vmem>>, vector<1x128xf32>
    tpu.vector_store %arg5[%c7, %c0_43], %92 {strides = array<i32>} : memref<32x256xf32, #tpu.memory_space<vmem>>, vector<1x128xf32>,
    %94 = arith.index_cast %90 : i32 to index
    %c0_44 = arith.constant 0 : index
    %95 = vector.load %arg4[%94, %c0_44] : memref<50x128xf32, #tpu.memory_space<vmem>>, vector<1x128xf32>
    %c7_45 = arith.constant 7 : index
    %c128_46 = arith.constant 128 : index
    %96 = vector.load %arg5[%c7_45, %c128_46] : memref<32x256xf32, #tpu.memory_space<vmem>>, vector<1x128xf32>
    tpu.vector_store %arg5[%c7_45, %c128_46], %95 {strides = array<i32>} : memref<32x256xf32, #tpu.memory_space<vmem>>, vector<1x128xf32>,
    %c8_i32 = arith.constant 8 : i32
    %97 = arith.addi %0, %c8_i32 : i32
    %98 = arith.index_cast %97 : i32 to index
    %99 = memref.load %arg1[%98] : memref<64xi32, #tpu.memory_space<smem>>
    %c8_i32_47 = arith.constant 8 : i32
    %100 = arith.addi %0, %c8_i32_47 : i32
    %101 = arith.index_cast %100 : i32 to index
    %102 = memref.load %arg2[%101] : memref<64xi32, #tpu.memory_space<smem>>
    %103 = arith.index_cast %99 : i32 to index
    %c0_48 = arith.constant 0 : index
    %104 = vector.load %arg3[%103, %c0_48] : memref<500x128xf32, #tpu.memory_space<vmem>>, vector<1x128xf32>
    %c8 = arith.constant 8 : index
    %c0_49 = arith.constant 0 : index
    %105 = vector.load %arg5[%c8, %c0_49] : memref<32x256xf32, #tpu.memory_space<vmem>>, vector<1x128xf32>
    tpu.vector_store %arg5[%c8, %c0_49], %104 {strides = array<i32>} : memref<32x256xf32, #tpu.memory_space<vmem>>, vector<1x128xf32>,
    %106 = arith.index_cast %102 : i32 to index
    %c0_50 = arith.constant 0 : index
    %107 = vector.load %arg4[%106, %c0_50] : memref<50x128xf32, #tpu.memory_space<vmem>>, vector<1x128xf32>
    %c8_51 = arith.constant 8 : index
    %c128_52 = arith.constant 128 : index
    %108 = vector.load %arg5[%c8_51, %c128_52] : memref<32x256xf32, #tpu.memory_space<vmem>>, vector<1x128xf32>
    tpu.vector_store %arg5[%c8_51, %c128_52], %107 {strides = array<i32>} : memref<32x256xf32, #tpu.memory_space<vmem>>, vector<1x128xf32>,
    %c9_i32 = arith.constant 9 : i32
    %109 = arith.addi %0, %c9_i32 : i32
    %110 = arith.index_cast %109 : i32 to index
    %111 = memref.load %arg1[%110] : memref<64xi32, #tpu.memory_space<smem>>
    %c9_i32_53 = arith.constant 9 : i32
    %112 = arith.addi %0, %c9_i32_53 : i32
    %113 = arith.index_cast %112 : i32 to index
    %114 = memref.load %arg2[%113] : memref<64xi32, #tpu.memory_space<smem>>
    %115 = arith.index_cast %111 : i32 to index
    %c0_54 = arith.constant 0 : index
    %116 = vector.load %arg3[%115, %c0_54] : memref<500x128xf32, #tpu.memory_space<vmem>>, vector<1x128xf32>
    %c9 = arith.constant 9 : index
    %c0_55 = arith.constant 0 : index
    %117 = vector.load %arg5[%c9, %c0_55] : memref<32x256xf32, #tpu.memory_space<vmem>>, vector<1x128xf32>
    tpu.vector_store %arg5[%c9, %c0_55], %116 {strides = array<i32>} : memref<32x256xf32, #tpu.memory_space<vmem>>, vector<1x128xf32>,
    %118 = arith.index_cast %114 : i32 to index
    %c0_56 = arith.constant 0 : index
    %119 = vector.load %arg4[%118, %c0_56] : memref<50x128xf32, #tpu.memory_space<vmem>>, vector<1x128xf32>
    %c9_57 = arith.constant 9 : index
    %c128_58 = arith.constant 128 : index
    %120 = vector.load %arg5[%c9_57, %c128_58] : memref<32x256xf32, #tpu.memory_space<vmem>>, vector<1x128xf32>
    tpu.vector_store %arg5[%c9_57, %c128_58], %119 {strides = array<i32>} : memref<32x256xf32, #tpu.memory_space<vmem>>, vector<1x128xf32>,
    %c10_i32 = arith.constant 10 : i32
    %121 = arith.addi %0, %c10_i32 : i32
    %122 = arith.index_cast %121 : i32 to index
    %123 = memref.load %arg1[%122] : memref<64xi32, #tpu.memory_space<smem>>
    %c10_i32_59 = arith.constant 10 : i32
    %124 = arith.addi %0, %c10_i32_59 : i32
    %125 = arith.index_cast %124 : i32 to index
    %126 = memref.load %arg2[%125] : memref<64xi32, #tpu.memory_space<smem>>
    %127 = arith.index_cast %123 : i32 to index
    %c0_60 = arith.constant 0 : index
    %128 = vector.load %arg3[%127, %c0_60] : memref<500x128xf32, #tpu.memory_space<vmem>>, vector<1x128xf32>
    %c10 = arith.constant 10 : index
    %c0_61 = arith.constant 0 : index
    %129 = vector.load %arg5[%c10, %c0_61] : memref<32x256xf32, #tpu.memory_space<vmem>>, vector<1x128xf32>
    tpu.vector_store %arg5[%c10, %c0_61], %128 {strides = array<i32>} : memref<32x256xf32, #tpu.memory_space<vmem>>, vector<1x128xf32>,
    %130 = arith.index_cast %126 : i32 to index
    %c0_62 = arith.constant 0 : index
    %131 = vector.load %arg4[%130, %c0_62] : memref<50x128xf32, #tpu.memory_space<vmem>>, vector<1x128xf32>
    %c10_63 = arith.constant 10 : index
    %c128_64 = arith.constant 128 : index
    %132 = vector.load %arg5[%c10_63, %c128_64] : memref<32x256xf32, #tpu.memory_space<vmem>>, vector<1x128xf32>
    tpu.vector_store %arg5[%c10_63, %c128_64], %131 {strides = array<i32>} : memref<32x256xf32, #tpu.memory_space<vmem>>, vector<1x128xf32>,
    %c11_i32 = arith.constant 11 : i32
    %133 = arith.addi %0, %c11_i32 : i32
    %134 = arith.index_cast %133 : i32 to index
    %135 = memref.load %arg1[%134] : memref<64xi32, #tpu.memory_space<smem>>
    %c11_i32_65 = arith.constant 11 : i32
    %136 = arith.addi %0, %c11_i32_65 : i32
    %137 = arith.index_cast %136 : i32 to index
    %138 = memref.load %arg2[%137] : memref<64xi32, #tpu.memory_space<smem>>
    %139 = arith.index_cast %135 : i32 to index
    %c0_66 = arith.constant 0 : index
    %140 = vector.load %arg3[%139, %c0_66] : memref<500x128xf32, #tpu.memory_space<vmem>>, vector<1x128xf32>
    %c11 = arith.constant 11 : index
    %c0_67 = arith.constant 0 : index
    %141 = vector.load %arg5[%c11, %c0_67] : memref<32x256xf32, #tpu.memory_space<vmem>>, vector<1x128xf32>
    tpu.vector_store %arg5[%c11, %c0_67], %140 {strides = array<i32>} : memref<32x256xf32, #tpu.memory_space<vmem>>, vector<1x128xf32>,
    %142 = arith.index_cast %138 : i32 to index
    %c0_68 = arith.constant 0 : index
    %143 = vector.load %arg4[%142, %c0_68] : memref<50x128xf32, #tpu.memory_space<vmem>>, vector<1x128xf32>
    %c11_69 = arith.constant 11 : index
    %c128_70 = arith.constant 128 : index
    %144 = vector.load %arg5[%c11_69, %c128_70] : memref<32x256xf32, #tpu.memory_space<vmem>>, vector<1x128xf32>
    tpu.vector_store %arg5[%c11_69, %c128_70], %143 {strides = array<i32>} : memref<32x256xf32, #tpu.memory_space<vmem>>, vector<1x128xf32>,
    %c12_i32 = arith.constant 12 : i32
    %145 = arith.addi %0, %c12_i32 : i32
    %146 = arith.index_cast %145 : i32 to index
    %147 = memref.load %arg1[%146] : memref<64xi32, #tpu.memory_space<smem>>
    %c12_i32_71 = arith.constant 12 : i32
    %148 = arith.addi %0, %c12_i32_71 : i32
    %149 = arith.index_cast %148 : i32 to index
    %150 = memref.load %arg2[%149] : memref<64xi32, #tpu.memory_space<smem>>
    %151 = arith.index_cast %147 : i32 to index
    %c0_72 = arith.constant 0 : index
    %152 = vector.load %arg3[%151, %c0_72] : memref<500x128xf32, #tpu.memory_space<vmem>>, vector<1x128xf32>
    %c12 = arith.constant 12 : index
    %c0_73 = arith.constant 0 : index
    %153 = vector.load %arg5[%c12, %c0_73] : memref<32x256xf32, #tpu.memory_space<vmem>>, vector<1x128xf32>
    tpu.vector_store %arg5[%c12, %c0_73], %152 {strides = array<i32>} : memref<32x256xf32, #tpu.memory_space<vmem>>, vector<1x128xf32>,
    %154 = arith.index_cast %150 : i32 to index
    %c0_74 = arith.constant 0 : index
    %155 = vector.load %arg4[%154, %c0_74] : memref<50x128xf32, #tpu.memory_space<vmem>>, vector<1x128xf32>
    %c12_75 = arith.constant 12 : index
    %c128_76 = arith.constant 128 : index
    %156 = vector.load %arg5[%c12_75, %c128_76] : memref<32x256xf32, #tpu.memory_space<vmem>>, vector<1x128xf32>
    tpu.vector_store %arg5[%c12_75, %c128_76], %155 {strides = array<i32>} : memref<32x256xf32, #tpu.memory_space<vmem>>, vector<1x128xf32>,
    %c13_i32 = arith.constant 13 : i32
    %157 = arith.addi %0, %c13_i32 : i32
    %158 = arith.index_cast %157 : i32 to index
    %159 = memref.load %arg1[%158] : memref<64xi32, #tpu.memory_space<smem>>
    %c13_i32_77 = arith.constant 13 : i32
    %160 = arith.addi %0, %c13_i32_77 : i32
    %161 = arith.index_cast %160 : i32 to index
    %162 = memref.load %arg2[%161] : memref<64xi32, #tpu.memory_space<smem>>
    %163 = arith.index_cast %159 : i32 to index
    %c0_78 = arith.constant 0 : index
    %164 = vector.load %arg3[%163, %c0_78] : memref<500x128xf32, #tpu.memory_space<vmem>>, vector<1x128xf32>
    %c13 = arith.constant 13 : index
    %c0_79 = arith.constant 0 : index
    %165 = vector.load %arg5[%c13, %c0_79] : memref<32x256xf32, #tpu.memory_space<vmem>>, vector<1x128xf32>
    tpu.vector_store %arg5[%c13, %c0_79], %164 {strides = array<i32>} : memref<32x256xf32, #tpu.memory_space<vmem>>, vector<1x128xf32>,
    %166 = arith.index_cast %162 : i32 to index
    %c0_80 = arith.constant 0 : index
    %167 = vector.load %arg4[%166, %c0_80] : memref<50x128xf32, #tpu.memory_space<vmem>>, vector<1x128xf32>
    %c13_81 = arith.constant 13 : index
    %c128_82 = arith.constant 128 : index
    %168 = vector.load %arg5[%c13_81, %c128_82] : memref<32x256xf32, #tpu.memory_space<vmem>>, vector<1x128xf32>
    tpu.vector_store %arg5[%c13_81, %c128_82], %167 {strides = array<i32>} : memref<32x256xf32, #tpu.memory_space<vmem>>, vector<1x128xf32>,
    %c14_i32 = arith.constant 14 : i32
    %169 = arith.addi %0, %c14_i32 : i32
    %170 = arith.index_cast %169 : i32 to index
    %171 = memref.load %arg1[%170] : memref<64xi32, #tpu.memory_space<smem>>
    %c14_i32_83 = arith.constant 14 : i32
    %172 = arith.addi %0, %c14_i32_83 : i32
    %173 = arith.index_cast %172 : i32 to index
    %174 = memref.load %arg2[%173] : memref<64xi32, #tpu.memory_space<smem>>
    %175 = arith.index_cast %171 : i32 to index
    %c0_84 = arith.constant 0 : index
    %176 = vector.load %arg3[%175, %c0_84] : memref<500x128xf32, #tpu.memory_space<vmem>>, vector<1x128xf32>
    %c14 = arith.constant 14 : index
    %c0_85 = arith.constant 0 : index
    %177 = vector.load %arg5[%c14, %c0_85] : memref<32x256xf32, #tpu.memory_space<vmem>>, vector<1x128xf32>
    tpu.vector_store %arg5[%c14, %c0_85], %176 {strides = array<i32>} : memref<32x256xf32, #tpu.memory_space<vmem>>, vector<1x128xf32>,
    %178 = arith.index_cast %174 : i32 to index
    %c0_86 = arith.constant 0 : index
    %179 = vector.load %arg4[%178, %c0_86] : memref<50x128xf32, #tpu.memory_space<vmem>>, vector<1x128xf32>
    %c14_87 = arith.constant 14 : index
    %c128_88 = arith.constant 128 : index
    %180 = vector.load %arg5[%c14_87, %c128_88] : memref<32x256xf32, #tpu.memory_space<vmem>>, vector<1x128xf32>
    tpu.vector_store %arg5[%c14_87, %c128_88], %179 {strides = array<i32>} : memref<32x256xf32, #tpu.memory_space<vmem>>, vector<1x128xf32>,
    %c15_i32 = arith.constant 15 : i32
    %181 = arith.addi %0, %c15_i32 : i32
    %182 = arith.index_cast %181 : i32 to index
    %183 = memref.load %arg1[%182] : memref<64xi32, #tpu.memory_space<smem>>
    %c15_i32_89 = arith.constant 15 : i32
    %184 = arith.addi %0, %c15_i32_89 : i32
    %185 = arith.index_cast %184 : i32 to index
    %186 = memref.load %arg2[%185] : memref<64xi32, #tpu.memory_space<smem>>
    %187 = arith.index_cast %183 : i32 to index
    %c0_90 = arith.constant 0 : index
    %188 = vector.load %arg3[%187, %c0_90] : memref<500x128xf32, #tpu.memory_space<vmem>>, vector<1x128xf32>
    %c15 = arith.constant 15 : index
    %c0_91 = arith.constant 0 : index
    %189 = vector.load %arg5[%c15, %c0_91] : memref<32x256xf32, #tpu.memory_space<vmem>>, vector<1x128xf32>
    tpu.vector_store %arg5[%c15, %c0_91], %188 {strides = array<i32>} : memref<32x256xf32, #tpu.memory_space<vmem>>, vector<1x128xf32>,
    %190 = arith.index_cast %186 : i32 to index
    %c0_92 = arith.constant 0 : index
    %191 = vector.load %arg4[%190, %c0_92] : memref<50x128xf32, #tpu.memory_space<vmem>>, vector<1x128xf32>
    %c15_93 = arith.constant 15 : index
    %c128_94 = arith.constant 128 : index
    %192 = vector.load %arg5[%c15_93, %c128_94] : memref<32x256xf32, #tpu.memory_space<vmem>>, vector<1x128xf32>
    tpu.vector_store %arg5[%c15_93, %c128_94], %191 {strides = array<i32>} : memref<32x256xf32, #tpu.memory_space<vmem>>, vector<1x128xf32>,
    %c16_i32 = arith.constant 16 : i32
    %193 = arith.addi %0, %c16_i32 : i32
    %194 = arith.index_cast %193 : i32 to index
    %195 = memref.load %arg1[%194] : memref<64xi32, #tpu.memory_space<smem>>
    %c16_i32_95 = arith.constant 16 : i32
    %196 = arith.addi %0, %c16_i32_95 : i32
    %197 = arith.index_cast %196 : i32 to index
    %198 = memref.load %arg2[%197] : memref<64xi32, #tpu.memory_space<smem>>
    %199 = arith.index_cast %195 : i32 to index
    %c0_96 = arith.constant 0 : index
    %200 = vector.load %arg3[%199, %c0_96] : memref<500x128xf32, #tpu.memory_space<vmem>>, vector<1x128xf32>
    %c16 = arith.constant 16 : index
    %c0_97 = arith.constant 0 : index
    %201 = vector.load %arg5[%c16, %c0_97] : memref<32x256xf32, #tpu.memory_space<vmem>>, vector<1x128xf32>
    tpu.vector_store %arg5[%c16, %c0_97], %200 {strides = array<i32>} : memref<32x256xf32, #tpu.memory_space<vmem>>, vector<1x128xf32>,
    %202 = arith.index_cast %198 : i32 to index
    %c0_98 = arith.constant 0 : index
    %203 = vector.load %arg4[%202, %c0_98] : memref<50x128xf32, #tpu.memory_space<vmem>>, vector<1x128xf32>
    %c16_99 = arith.constant 16 : index
    %c128_100 = arith.constant 128 : index
    %204 = vector.load %arg5[%c16_99, %c128_100] : memref<32x256xf32, #tpu.memory_space<vmem>>, vector<1x128xf32>
    tpu.vector_store %arg5[%c16_99, %c128_100], %203 {strides = array<i32>} : memref<32x256xf32, #tpu.memory_space<vmem>>, vector<1x128xf32>,
    %c17_i32 = arith.constant 17 : i32
    %205 = arith.addi %0, %c17_i32 : i32
    %206 = arith.index_cast %205 : i32 to index
    %207 = memref.load %arg1[%206] : memref<64xi32, #tpu.memory_space<smem>>
    %c17_i32_101 = arith.constant 17 : i32
    %208 = arith.addi %0, %c17_i32_101 : i32
    %209 = arith.index_cast %208 : i32 to index
    %210 = memref.load %arg2[%209] : memref<64xi32, #tpu.memory_space<smem>>
    %211 = arith.index_cast %207 : i32 to index
    %c0_102 = arith.constant 0 : index
    %212 = vector.load %arg3[%211, %c0_102] : memref<500x128xf32, #tpu.memory_space<vmem>>, vector<1x128xf32>
    %c17 = arith.constant 17 : index
    %c0_103 = arith.constant 0 : index
    %213 = vector.load %arg5[%c17, %c0_103] : memref<32x256xf32, #tpu.memory_space<vmem>>, vector<1x128xf32>
    tpu.vector_store %arg5[%c17, %c0_103], %212 {strides = array<i32>} : memref<32x256xf32, #tpu.memory_space<vmem>>, vector<1x128xf32>,
    %214 = arith.index_cast %210 : i32 to index
    %c0_104 = arith.constant 0 : index
    %215 = vector.load %arg4[%214, %c0_104] : memref<50x128xf32, #tpu.memory_space<vmem>>, vector<1x128xf32>
    %c17_105 = arith.constant 17 : index
    %c128_106 = arith.constant 128 : index
    %216 = vector.load %arg5[%c17_105, %c128_106] : memref<32x256xf32, #tpu.memory_space<vmem>>, vector<1x128xf32>
    tpu.vector_store %arg5[%c17_105, %c128_106], %215 {strides = array<i32>} : memref<32x256xf32, #tpu.memory_space<vmem>>, vector<1x128xf32>,
    %c18_i32 = arith.constant 18 : i32
    %217 = arith.addi %0, %c18_i32 : i32
    %218 = arith.index_cast %217 : i32 to index
    %219 = memref.load %arg1[%218] : memref<64xi32, #tpu.memory_space<smem>>
    %c18_i32_107 = arith.constant 18 : i32
    %220 = arith.addi %0, %c18_i32_107 : i32
    %221 = arith.index_cast %220 : i32 to index
    %222 = memref.load %arg2[%221] : memref<64xi32, #tpu.memory_space<smem>>
    %223 = arith.index_cast %219 : i32 to index
    %c0_108 = arith.constant 0 : index
    %224 = vector.load %arg3[%223, %c0_108] : memref<500x128xf32, #tpu.memory_space<vmem>>, vector<1x128xf32>
    %c18 = arith.constant 18 : index
    %c0_109 = arith.constant 0 : index
    %225 = vector.load %arg5[%c18, %c0_109] : memref<32x256xf32, #tpu.memory_space<vmem>>, vector<1x128xf32>
    tpu.vector_store %arg5[%c18, %c0_109], %224 {strides = array<i32>} : memref<32x256xf32, #tpu.memory_space<vmem>>, vector<1x128xf32>,
    %226 = arith.index_cast %222 : i32 to index
    %c0_110 = arith.constant 0 : index
    %227 = vector.load %arg4[%226, %c0_110] : memref<50x128xf32, #tpu.memory_space<vmem>>, vector<1x128xf32>
    %c18_111 = arith.constant 18 : index
    %c128_112 = arith.constant 128 : index
    %228 = vector.load %arg5[%c18_111, %c128_112] : memref<32x256xf32, #tpu.memory_space<vmem>>, vector<1x128xf32>
    tpu.vector_store %arg5[%c18_111, %c128_112], %227 {strides = array<i32>} : memref<32x256xf32, #tpu.memory_space<vmem>>, vector<1x128xf32>,
    %c19_i32 = arith.constant 19 : i32
    %229 = arith.addi %0, %c19_i32 : i32
    %230 = arith.index_cast %229 : i32 to index
    %231 = memref.load %arg1[%230] : memref<64xi32, #tpu.memory_space<smem>>
    %c19_i32_113 = arith.constant 19 : i32
    %232 = arith.addi %0, %c19_i32_113 : i32
    %233 = arith.index_cast %232 : i32 to index
    %234 = memref.load %arg2[%233] : memref<64xi32, #tpu.memory_space<smem>>
    %235 = arith.index_cast %231 : i32 to index
    %c0_114 = arith.constant 0 : index
    %236 = vector.load %arg3[%235, %c0_114] : memref<500x128xf32, #tpu.memory_space<vmem>>, vector<1x128xf32>
    %c19 = arith.constant 19 : index
    %c0_115 = arith.constant 0 : index
    %237 = vector.load %arg5[%c19, %c0_115] : memref<32x256xf32, #tpu.memory_space<vmem>>, vector<1x128xf32>
    tpu.vector_store %arg5[%c19, %c0_115], %236 {strides = array<i32>} : memref<32x256xf32, #tpu.memory_space<vmem>>, vector<1x128xf32>,
    %238 = arith.index_cast %234 : i32 to index
    %c0_116 = arith.constant 0 : index
    %239 = vector.load %arg4[%238, %c0_116] : memref<50x128xf32, #tpu.memory_space<vmem>>, vector<1x128xf32>
    %c19_117 = arith.constant 19 : index
    %c128_118 = arith.constant 128 : index
    %240 = vector.load %arg5[%c19_117, %c128_118] : memref<32x256xf32, #tpu.memory_space<vmem>>, vector<1x128xf32>
    tpu.vector_store %arg5[%c19_117, %c128_118], %239 {strides = array<i32>} : memref<32x256xf32, #tpu.memory_space<vmem>>, vector<1x128xf32>,
    %c20_i32 = arith.constant 20 : i32
    %241 = arith.addi %0, %c20_i32 : i32
    %242 = arith.index_cast %241 : i32 to index
    %243 = memref.load %arg1[%242] : memref<64xi32, #tpu.memory_space<smem>>
    %c20_i32_119 = arith.constant 20 : i32
    %244 = arith.addi %0, %c20_i32_119 : i32
    %245 = arith.index_cast %244 : i32 to index
    %246 = memref.load %arg2[%245] : memref<64xi32, #tpu.memory_space<smem>>
    %247 = arith.index_cast %243 : i32 to index
    %c0_120 = arith.constant 0 : index
    %248 = vector.load %arg3[%247, %c0_120] : memref<500x128xf32, #tpu.memory_space<vmem>>, vector<1x128xf32>
    %c20 = arith.constant 20 : index
    %c0_121 = arith.constant 0 : index
    %249 = vector.load %arg5[%c20, %c0_121] : memref<32x256xf32, #tpu.memory_space<vmem>>, vector<1x128xf32>
    tpu.vector_store %arg5[%c20, %c0_121], %248 {strides = array<i32>} : memref<32x256xf32, #tpu.memory_space<vmem>>, vector<1x128xf32>,
    %250 = arith.index_cast %246 : i32 to index
    %c0_122 = arith.constant 0 : index
    %251 = vector.load %arg4[%250, %c0_122] : memref<50x128xf32, #tpu.memory_space<vmem>>, vector<1x128xf32>
    %c20_123 = arith.constant 20 : index
    %c128_124 = arith.constant 128 : index
    %252 = vector.load %arg5[%c20_123, %c128_124] : memref<32x256xf32, #tpu.memory_space<vmem>>, vector<1x128xf32>
    tpu.vector_store %arg5[%c20_123, %c128_124], %251 {strides = array<i32>} : memref<32x256xf32, #tpu.memory_space<vmem>>, vector<1x128xf32>,
    %c21_i32 = arith.constant 21 : i32
    %253 = arith.addi %0, %c21_i32 : i32
    %254 = arith.index_cast %253 : i32 to index
    %255 = memref.load %arg1[%254] : memref<64xi32, #tpu.memory_space<smem>>
    %c21_i32_125 = arith.constant 21 : i32
    %256 = arith.addi %0, %c21_i32_125 : i32
    %257 = arith.index_cast %256 : i32 to index
    %258 = memref.load %arg2[%257] : memref<64xi32, #tpu.memory_space<smem>>
    %259 = arith.index_cast %255 : i32 to index
    %c0_126 = arith.constant 0 : index
    %260 = vector.load %arg3[%259, %c0_126] : memref<500x128xf32, #tpu.memory_space<vmem>>, vector<1x128xf32>
    %c21 = arith.constant 21 : index
    %c0_127 = arith.constant 0 : index
    %261 = vector.load %arg5[%c21, %c0_127] : memref<32x256xf32, #tpu.memory_space<vmem>>, vector<1x128xf32>
    tpu.vector_store %arg5[%c21, %c0_127], %260 {strides = array<i32>} : memref<32x256xf32, #tpu.memory_space<vmem>>, vector<1x128xf32>,
    %262 = arith.index_cast %258 : i32 to index
    %c0_128 = arith.constant 0 : index
    %263 = vector.load %arg4[%262, %c0_128] : memref<50x128xf32, #tpu.memory_space<vmem>>, vector<1x128xf32>
    %c21_129 = arith.constant 21 : index
    %c128_130 = arith.constant 128 : index
    %264 = vector.load %arg5[%c21_129, %c128_130] : memref<32x256xf32, #tpu.memory_space<vmem>>, vector<1x128xf32>
    tpu.vector_store %arg5[%c21_129, %c128_130], %263 {strides = array<i32>} : memref<32x256xf32, #tpu.memory_space<vmem>>, vector<1x128xf32>,
    %c22_i32 = arith.constant 22 : i32
    %265 = arith.addi %0, %c22_i32 : i32
    %266 = arith.index_cast %265 : i32 to index
    %267 = memref.load %arg1[%266] : memref<64xi32, #tpu.memory_space<smem>>
    %c22_i32_131 = arith.constant 22 : i32
    %268 = arith.addi %0, %c22_i32_131 : i32
    %269 = arith.index_cast %268 : i32 to index
    %270 = memref.load %arg2[%269] : memref<64xi32, #tpu.memory_space<smem>>
    %271 = arith.index_cast %267 : i32 to index
    %c0_132 = arith.constant 0 : index
    %272 = vector.load %arg3[%271, %c0_132] : memref<500x128xf32, #tpu.memory_space<vmem>>, vector<1x128xf32>
    %c22 = arith.constant 22 : index
    %c0_133 = arith.constant 0 : index
    %273 = vector.load %arg5[%c22, %c0_133] : memref<32x256xf32, #tpu.memory_space<vmem>>, vector<1x128xf32>
    tpu.vector_store %arg5[%c22, %c0_133], %272 {strides = array<i32>} : memref<32x256xf32, #tpu.memory_space<vmem>>, vector<1x128xf32>,
    %274 = arith.index_cast %270 : i32 to index
    %c0_134 = arith.constant 0 : index
    %275 = vector.load %arg4[%274, %c0_134] : memref<50x128xf32, #tpu.memory_space<vmem>>, vector<1x128xf32>
    %c22_135 = arith.constant 22 : index
    %c128_136 = arith.constant 128 : index
    %276 = vector.load %arg5[%c22_135, %c128_136] : memref<32x256xf32, #tpu.memory_space<vmem>>, vector<1x128xf32>
    tpu.vector_store %arg5[%c22_135, %c128_136], %275 {strides = array<i32>} : memref<32x256xf32, #tpu.memory_space<vmem>>, vector<1x128xf32>,
    %c23_i32 = arith.constant 23 : i32
    %277 = arith.addi %0, %c23_i32 : i32
    %278 = arith.index_cast %277 : i32 to index
    %279 = memref.load %arg1[%278] : memref<64xi32, #tpu.memory_space<smem>>
    %c23_i32_137 = arith.constant 23 : i32
    %280 = arith.addi %0, %c23_i32_137 : i32
    %281 = arith.index_cast %280 : i32 to index
    %282 = memref.load %arg2[%281] : memref<64xi32, #tpu.memory_space<smem>>
    %283 = arith.index_cast %279 : i32 to index
    %c0_138 = arith.constant 0 : index
    %284 = vector.load %arg3[%283, %c0_138] : memref<500x128xf32, #tpu.memory_space<vmem>>, vector<1x128xf32>
    %c23 = arith.constant 23 : index
    %c0_139 = arith.constant 0 : index
    %285 = vector.load %arg5[%c23, %c0_139] : memref<32x256xf32, #tpu.memory_space<vmem>>, vector<1x128xf32>
    tpu.vector_store %arg5[%c23, %c0_139], %284 {strides = array<i32>} : memref<32x256xf32, #tpu.memory_space<vmem>>, vector<1x128xf32>,
    %286 = arith.index_cast %282 : i32 to index
    %c0_140 = arith.constant 0 : index
    %287 = vector.load %arg4[%286, %c0_140] : memref<50x128xf32, #tpu.memory_space<vmem>>, vector<1x128xf32>
    %c23_141 = arith.constant 23 : index
    %c128_142 = arith.constant 128 : index
    %288 = vector.load %arg5[%c23_141, %c128_142] : memref<32x256xf32, #tpu.memory_space<vmem>>, vector<1x128xf32>
    tpu.vector_store %arg5[%c23_141, %c128_142], %287 {strides = array<i32>} : memref<32x256xf32, #tpu.memory_space<vmem>>, vector<1x128xf32>,
    %c24_i32 = arith.constant 24 : i32
    %289 = arith.addi %0, %c24_i32 : i32
    %290 = arith.index_cast %289 : i32 to index
    %291 = memref.load %arg1[%290] : memref<64xi32, #tpu.memory_space<smem>>
    %c24_i32_143 = arith.constant 24 : i32
    %292 = arith.addi %0, %c24_i32_143 : i32
    %293 = arith.index_cast %292 : i32 to index
    %294 = memref.load %arg2[%293] : memref<64xi32, #tpu.memory_space<smem>>
    %295 = arith.index_cast %291 : i32 to index
    %c0_144 = arith.constant 0 : index
    %296 = vector.load %arg3[%295, %c0_144] : memref<500x128xf32, #tpu.memory_space<vmem>>, vector<1x128xf32>
    %c24 = arith.constant 24 : index
    %c0_145 = arith.constant 0 : index
    %297 = vector.load %arg5[%c24, %c0_145] : memref<32x256xf32, #tpu.memory_space<vmem>>, vector<1x128xf32>
    tpu.vector_store %arg5[%c24, %c0_145], %296 {strides = array<i32>} : memref<32x256xf32, #tpu.memory_space<vmem>>, vector<1x128xf32>,
    %298 = arith.index_cast %294 : i32 to index
    %c0_146 = arith.constant 0 : index
    %299 = vector.load %arg4[%298, %c0_146] : memref<50x128xf32, #tpu.memory_space<vmem>>, vector<1x128xf32>
    %c24_147 = arith.constant 24 : index
    %c128_148 = arith.constant 128 : index
    %300 = vector.load %arg5[%c24_147, %c128_148] : memref<32x256xf32, #tpu.memory_space<vmem>>, vector<1x128xf32>
    tpu.vector_store %arg5[%c24_147, %c128_148], %299 {strides = array<i32>} : memref<32x256xf32, #tpu.memory_space<vmem>>, vector<1x128xf32>,
    %c25_i32 = arith.constant 25 : i32
    %301 = arith.addi %0, %c25_i32 : i32
    %302 = arith.index_cast %301 : i32 to index
    %303 = memref.load %arg1[%302] : memref<64xi32, #tpu.memory_space<smem>>
    %c25_i32_149 = arith.constant 25 : i32
    %304 = arith.addi %0, %c25_i32_149 : i32
    %305 = arith.index_cast %304 : i32 to index
    %306 = memref.load %arg2[%305] : memref<64xi32, #tpu.memory_space<smem>>
    %307 = arith.index_cast %303 : i32 to index
    %c0_150 = arith.constant 0 : index
    %308 = vector.load %arg3[%307, %c0_150] : memref<500x128xf32, #tpu.memory_space<vmem>>, vector<1x128xf32>
    %c25 = arith.constant 25 : index
    %c0_151 = arith.constant 0 : index
    %309 = vector.load %arg5[%c25, %c0_151] : memref<32x256xf32, #tpu.memory_space<vmem>>, vector<1x128xf32>
    tpu.vector_store %arg5[%c25, %c0_151], %308 {strides = array<i32>} : memref<32x256xf32, #tpu.memory_space<vmem>>, vector<1x128xf32>,
    %310 = arith.index_cast %306 : i32 to index
    %c0_152 = arith.constant 0 : index
    %311 = vector.load %arg4[%310, %c0_152] : memref<50x128xf32, #tpu.memory_space<vmem>>, vector<1x128xf32>
    %c25_153 = arith.constant 25 : index
    %c128_154 = arith.constant 128 : index
    %312 = vector.load %arg5[%c25_153, %c128_154] : memref<32x256xf32, #tpu.memory_space<vmem>>, vector<1x128xf32>
    tpu.vector_store %arg5[%c25_153, %c128_154], %311 {strides = array<i32>} : memref<32x256xf32, #tpu.memory_space<vmem>>, vector<1x128xf32>,
    %c26_i32 = arith.constant 26 : i32
    %313 = arith.addi %0, %c26_i32 : i32
    %314 = arith.index_cast %313 : i32 to index
    %315 = memref.load %arg1[%314] : memref<64xi32, #tpu.memory_space<smem>>
    %c26_i32_155 = arith.constant 26 : i32
    %316 = arith.addi %0, %c26_i32_155 : i32
    %317 = arith.index_cast %316 : i32 to index
    %318 = memref.load %arg2[%317] : memref<64xi32, #tpu.memory_space<smem>>
    %319 = arith.index_cast %315 : i32 to index
    %c0_156 = arith.constant 0 : index
    %320 = vector.load %arg3[%319, %c0_156] : memref<500x128xf32, #tpu.memory_space<vmem>>, vector<1x128xf32>
    %c26 = arith.constant 26 : index
    %c0_157 = arith.constant 0 : index
    %321 = vector.load %arg5[%c26, %c0_157] : memref<32x256xf32, #tpu.memory_space<vmem>>, vector<1x128xf32>
    tpu.vector_store %arg5[%c26, %c0_157], %320 {strides = array<i32>} : memref<32x256xf32, #tpu.memory_space<vmem>>, vector<1x128xf32>,
    %322 = arith.index_cast %318 : i32 to index
    %c0_158 = arith.constant 0 : index
    %323 = vector.load %arg4[%322, %c0_158] : memref<50x128xf32, #tpu.memory_space<vmem>>, vector<1x128xf32>
    %c26_159 = arith.constant 26 : index
    %c128_160 = arith.constant 128 : index
    %324 = vector.load %arg5[%c26_159, %c128_160] : memref<32x256xf32, #tpu.memory_space<vmem>>, vector<1x128xf32>
    tpu.vector_store %arg5[%c26_159, %c128_160], %323 {strides = array<i32>} : memref<32x256xf32, #tpu.memory_space<vmem>>, vector<1x128xf32>,
    %c27_i32 = arith.constant 27 : i32
    %325 = arith.addi %0, %c27_i32 : i32
    %326 = arith.index_cast %325 : i32 to index
    %327 = memref.load %arg1[%326] : memref<64xi32, #tpu.memory_space<smem>>
    %c27_i32_161 = arith.constant 27 : i32
    %328 = arith.addi %0, %c27_i32_161 : i32
    %329 = arith.index_cast %328 : i32 to index
    %330 = memref.load %arg2[%329] : memref<64xi32, #tpu.memory_space<smem>>
    %331 = arith.index_cast %327 : i32 to index
    %c0_162 = arith.constant 0 : index
    %332 = vector.load %arg3[%331, %c0_162] : memref<500x128xf32, #tpu.memory_space<vmem>>, vector<1x128xf32>
    %c27 = arith.constant 27 : index
    %c0_163 = arith.constant 0 : index
    %333 = vector.load %arg5[%c27, %c0_163] : memref<32x256xf32, #tpu.memory_space<vmem>>, vector<1x128xf32>
    tpu.vector_store %arg5[%c27, %c0_163], %332 {strides = array<i32>} : memref<32x256xf32, #tpu.memory_space<vmem>>, vector<1x128xf32>,
    %334 = arith.index_cast %330 : i32 to index
    %c0_164 = arith.constant 0 : index
    %335 = vector.load %arg4[%334, %c0_164] : memref<50x128xf32, #tpu.memory_space<vmem>>, vector<1x128xf32>
    %c27_165 = arith.constant 27 : index
    %c128_166 = arith.constant 128 : index
    %336 = vector.load %arg5[%c27_165, %c128_166] : memref<32x256xf32, #tpu.memory_space<vmem>>, vector<1x128xf32>
    tpu.vector_store %arg5[%c27_165, %c128_166], %335 {strides = array<i32>} : memref<32x256xf32, #tpu.memory_space<vmem>>, vector<1x128xf32>,
    %c28_i32 = arith.constant 28 : i32
    %337 = arith.addi %0, %c28_i32 : i32
    %338 = arith.index_cast %337 : i32 to index
    %339 = memref.load %arg1[%338] : memref<64xi32, #tpu.memory_space<smem>>
    %c28_i32_167 = arith.constant 28 : i32
    %340 = arith.addi %0, %c28_i32_167 : i32
    %341 = arith.index_cast %340 : i32 to index
    %342 = memref.load %arg2[%341] : memref<64xi32, #tpu.memory_space<smem>>
    %343 = arith.index_cast %339 : i32 to index
    %c0_168 = arith.constant 0 : index
    %344 = vector.load %arg3[%343, %c0_168] : memref<500x128xf32, #tpu.memory_space<vmem>>, vector<1x128xf32>
    %c28 = arith.constant 28 : index
    %c0_169 = arith.constant 0 : index
    %345 = vector.load %arg5[%c28, %c0_169] : memref<32x256xf32, #tpu.memory_space<vmem>>, vector<1x128xf32>
    tpu.vector_store %arg5[%c28, %c0_169], %344 {strides = array<i32>} : memref<32x256xf32, #tpu.memory_space<vmem>>, vector<1x128xf32>,
    %346 = arith.index_cast %342 : i32 to index
    %c0_170 = arith.constant 0 : index
    %347 = vector.load %arg4[%346, %c0_170] : memref<50x128xf32, #tpu.memory_space<vmem>>, vector<1x128xf32>
    %c28_171 = arith.constant 28 : index
    %c128_172 = arith.constant 128 : index
    %348 = vector.load %arg5[%c28_171, %c128_172] : memref<32x256xf32, #tpu.memory_space<vmem>>, vector<1x128xf32>
    tpu.vector_store %arg5[%c28_171, %c128_172], %347 {strides = array<i32>} : memref<32x256xf32, #tpu.memory_space<vmem>>, vector<1x128xf32>,
    %c29_i32 = arith.constant 29 : i32
    %349 = arith.addi %0, %c29_i32 : i32
    %350 = arith.index_cast %349 : i32 to index
    %351 = memref.load %arg1[%350] : memref<64xi32, #tpu.memory_space<smem>>
    %c29_i32_173 = arith.constant 29 : i32
    %352 = arith.addi %0, %c29_i32_173 : i32
    %353 = arith.index_cast %352 : i32 to index
    %354 = memref.load %arg2[%353] : memref<64xi32, #tpu.memory_space<smem>>
    %355 = arith.index_cast %351 : i32 to index
    %c0_174 = arith.constant 0 : index
    %356 = vector.load %arg3[%355, %c0_174] : memref<500x128xf32, #tpu.memory_space<vmem>>, vector<1x128xf32>
    %c29 = arith.constant 29 : index
    %c0_175 = arith.constant 0 : index
    %357 = vector.load %arg5[%c29, %c0_175] : memref<32x256xf32, #tpu.memory_space<vmem>>, vector<1x128xf32>
    tpu.vector_store %arg5[%c29, %c0_175], %356 {strides = array<i32>} : memref<32x256xf32, #tpu.memory_space<vmem>>, vector<1x128xf32>,
    %358 = arith.index_cast %354 : i32 to index
    %c0_176 = arith.constant 0 : index
    %359 = vector.load %arg4[%358, %c0_176] : memref<50x128xf32, #tpu.memory_space<vmem>>, vector<1x128xf32>
    %c29_177 = arith.constant 29 : index
    %c128_178 = arith.constant 128 : index
    %360 = vector.load %arg5[%c29_177, %c128_178] : memref<32x256xf32, #tpu.memory_space<vmem>>, vector<1x128xf32>
    tpu.vector_store %arg5[%c29_177, %c128_178], %359 {strides = array<i32>} : memref<32x256xf32, #tpu.memory_space<vmem>>, vector<1x128xf32>,
    %c30_i32 = arith.constant 30 : i32
    %361 = arith.addi %0, %c30_i32 : i32
    %362 = arith.index_cast %361 : i32 to index
    %363 = memref.load %arg1[%362] : memref<64xi32, #tpu.memory_space<smem>>
    %c30_i32_179 = arith.constant 30 : i32
    %364 = arith.addi %0, %c30_i32_179 : i32
    %365 = arith.index_cast %364 : i32 to index
    %366 = memref.load %arg2[%365] : memref<64xi32, #tpu.memory_space<smem>>
    %367 = arith.index_cast %363 : i32 to index
    %c0_180 = arith.constant 0 : index
    %368 = vector.load %arg3[%367, %c0_180] : memref<500x128xf32, #tpu.memory_space<vmem>>, vector<1x128xf32>
    %c30 = arith.constant 30 : index
    %c0_181 = arith.constant 0 : index
    %369 = vector.load %arg5[%c30, %c0_181] : memref<32x256xf32, #tpu.memory_space<vmem>>, vector<1x128xf32>
    tpu.vector_store %arg5[%c30, %c0_181], %368 {strides = array<i32>} : memref<32x256xf32, #tpu.memory_space<vmem>>, vector<1x128xf32>,
    %370 = arith.index_cast %366 : i32 to index
    %c0_182 = arith.constant 0 : index
    %371 = vector.load %arg4[%370, %c0_182] : memref<50x128xf32, #tpu.memory_space<vmem>>, vector<1x128xf32>
    %c30_183 = arith.constant 30 : index
    %c128_184 = arith.constant 128 : index
    %372 = vector.load %arg5[%c30_183, %c128_184] : memref<32x256xf32, #tpu.memory_space<vmem>>, vector<1x128xf32>
    tpu.vector_store %arg5[%c30_183, %c128_184], %371 {strides = array<i32>} : memref<32x256xf32, #tpu.memory_space<vmem>>, vector<1x128xf32>,
    %c31_i32 = arith.constant 31 : i32
    %373 = arith.addi %0, %c31_i32 : i32
    %374 = arith.index_cast %373 : i32 to index
    %375 = memref.load %arg1[%374] : memref<64xi32, #tpu.memory_space<smem>>
    %c31_i32_185 = arith.constant 31 : i32
    %376 = arith.addi %0, %c31_i32_185 : i32
    %377 = arith.index_cast %376 : i32 to index
    %378 = memref.load %arg2[%377] : memref<64xi32, #tpu.memory_space<smem>>
    %379 = arith.index_cast %375 : i32 to index
    %c0_186 = arith.constant 0 : index
    %380 = vector.load %arg3[%379, %c0_186] : memref<500x128xf32, #tpu.memory_space<vmem>>, vector<1x128xf32>
    %c31 = arith.constant 31 : index
    %c0_187 = arith.constant 0 : index
    %381 = vector.load %arg5[%c31, %c0_187] : memref<32x256xf32, #tpu.memory_space<vmem>>, vector<1x128xf32>
    tpu.vector_store %arg5[%c31, %c0_187], %380 {strides = array<i32>} : memref<32x256xf32, #tpu.memory_space<vmem>>, vector<1x128xf32>,
    %382 = arith.index_cast %378 : i32 to index
    %c0_188 = arith.constant 0 : index
    %383 = vector.load %arg4[%382, %c0_188] : memref<50x128xf32, #tpu.memory_space<vmem>>, vector<1x128xf32>
    %c31_189 = arith.constant 31 : index
    %c128_190 = arith.constant 128 : index
    %384 = vector.load %arg5[%c31_189, %c128_190] : memref<32x256xf32, #tpu.memory_space<vmem>>, vector<1x128xf32>
    tpu.vector_store %arg5[%c31_189, %c128_190], %383 {strides = array<i32>} : memref<32x256xf32, #tpu.memory_space<vmem>>, vector<1x128xf32>,
    %c0_191 = arith.constant 0 : index
    %c0_192 = arith.constant 0 : index
    %385 = vector.load %arg5[%c0_191, %c0_192] : memref<32x256xf32, #tpu.memory_space<vmem>>, vector<32x256xf32>
    %386 = arith.negf %385 : vector<32x256xf32>
    %387 = math.exp %386 : vector<32x256xf32>
    %cst = arith.constant 1.000000e+00 : f32
    %388 = vector.broadcast %cst : f32 to vector<32x256xf32>
    %389 = arith.addf %388, %387 : vector<32x256xf32>
    %390 = arith.divf %388, %389 : vector<32x256xf32>
    %c0_193 = arith.constant 0 : index
    %c0_194 = arith.constant 0 : index
    %391 = vector.load %arg6[%c0_193, %c0_194] : memref<32x256xf32, #tpu.memory_space<vmem>>, vector<32x256xf32>
    tpu.vector_store %arg6[%c0_193, %c0_194], %390 {strides = array<i32>} : memref<32x256xf32, #tpu.memory_space<vmem>>, vector<32x256xf32>,
    return
  }
  func.func @transform_0(%arg0: i32, %arg1: memref<64xi32, #tpu.memory_space<smem>>, %arg2: memref<64xi32, #tpu.memory_space<smem>>) -> (i32, i32) {
    %c0_i32 = arith.constant 0 : i32
    %c0_i32_0 = arith.constant 0 : i32
    %c0_i32_1 = arith.constant 0 : i32
    return %c0_i32, %c0_i32_0 : i32, i32
  }
  func.func @transform_1(%arg0: i32, %arg1: memref<64xi32, #tpu.memory_space<smem>>, %arg2: memref<64xi32, #tpu.memory_space<smem>>) -> (i32, i32) {
    %c0_i32 = arith.constant 0 : i32
    %c0_i32_0 = arith.constant 0 : i32
    %c0_i32_1 = arith.constant 0 : i32
    return %c0_i32, %c0_i32_0 : i32, i32
  }
  func.func @transform_2(%arg0: i32, %arg1: memref<64xi32, #tpu.memory_space<smem>>, %arg2: memref<64xi32, #tpu.memory_space<smem>>) -> (i32, i32) {
    %c0_i32 = arith.constant 0 : i32
    %c0_i32_0 = arith.constant 0 : i32
    return %arg0, %c0_i32 : i32, i32
  }
  func.func @transform_3(%arg0: i32, %arg1: memref<64xi32, #tpu.memory_space<smem>>, %arg2: memref<64xi32, #tpu.memory_space<smem>>) -> (i32, i32) {
    %c0_i32 = arith.constant 0 : i32
    %c0_i32_0 = arith.constant 0 : i32
    return %arg0, %c0_i32 : i32, i32
  }
}

</mosaic_0001>

<bundles_post_ra>
// kernel: tpu_custom_call.1
= control target key start
LH: loop header
LB: loop body
LE: loop exit
PB: predicated region body
PF: predicated region fallthrough
CT: control target
= control target key end

     0   :  { %s1068_s18 = smov [#allocation3]   ;;  %s1470_s0 = inlined_call_operand.hbm [shape: s32[64], index: 0, kind: input, shape index: {}]   ;;  %s1471_s2 = inlined_call_operand.hbm [shape: f32[500,128], index: 2, kind: input, shape index: {}]   ;;  %s1472_s3 = inlined_call_operand.hbm [shape: f32[50,128], index: 3, kind: input, shape index: {}]   ;;  %s1473_s4 = inlined_call_operand.hbm [shape: f32[64,256], index: 4, kind: output, shape index: {0}]   ;;  %s1474_s5 = inlined_call_operand.hbm [shape: f32[64,256], index: 5, kind: output, shape index: {1}]   ;;  %s1475_s1 = inlined_call_operand.vmem [shape: s32[64], index: 1, kind: input, shape index: {}]  }
   0x1   :  { %1478 = sst [smem:[#allocation19_spill]] %s1471_s2  ;;  %s13_s23 = sshll.u32 %s1475_s1, 4  ;;  %s14_s23 = int_to_ptr.vmem [resolvable:$true] %s13_s23 }
   0x2   :  { %1479 = sst [smem:[#allocation20_spill]] %s1472_s3  ;;  %s902_s24 = scalar_lea.vmem %s14_s23, 16 }
   0x3   :  { %12 = dma.hbm_to_smem %s1470_s0, 16, %s1068_s18, [#allocation2] }
   0x4   :  { %p903_p0 = scmp.ne.s32.totalorder %s14_s23, %s902_s24  ;;  %p907_p1 = scmp.lt.s32.totalorder %s14_s23, %s14_s23 }
   0x5   :  { %p908_p2 = scmp.lt.s32.totalorder %s902_s24, %s902_s24 }
   0x7   :  { %p909_p3 = por %p908_p2, %p907_p1 }
   0x9   :  { %p910_p4 = pnand %p909_p3, %p903_p0 }
   0xb   :  { %913 = shalt.err (!%p910_p4)  }
   0xc   :  { %s1069_s25 = smov [#allocation4]  }
   0xd   :  { %16 = dma.vmem_to_smem %s14_s23, 16, %s1069_s25, [#allocation2] }
   0xe   :  { %1034 = dma.done.wait [#allocation2], 32 }
   0xf   :  { %1035 = vsyncadd [#allocation2], 4294967264 }
  0x10   :  { %18 = sfence }
  0x11   :  { %19 = vsyncpa [#allocation6], 0 }
  0x12   :  { %20 = vsyncpa [#allocation9], 0 }
  0x13   :  { %21 = vsyncpa [#allocation7], 0 }
  0x14   :  { %23 = vsyncpa [#allocation7 + $0x1], 0 }
  0x15   :  { %24 = vsyncpa [#allocation12], 0 }
  0x16   :  { %26 = vsyncpa [#allocation12 + $0x1], 0  ;;  %s1114_s0 = smov 0   ;;  %s1116_s1 = smov 0  }
  0x17   :  { %s1118_s26 = smov 0   ;;  %s1120_s27 = smov 0  }
  0x18 LB: > { %s1135_s28 = sadd.s32 4294967295, %s1066_s27   ;;  %s759_s29 = sadd.s32 4294967294, %s1066_s27   ;;  %s1066_s27 = sphi %s1120_s27, %s1497_s27   ;;  %s1062_s26 = sphi %s1118_s26, %s1496_s26   ;;  %s1058_s1 = sphi %s1116_s1, %s1495_s1   ;;  %s1054_s0 = sphi %s1114_s0, %s1494_s0  }
  0x19   : > { %s1139_s30 = sadd.s32 1, %s1066_s27   ;;  %s81_s6 = sadd.s32 1, %s1062_s26 }
  0x1a   : > { %s78_s7 = ssub.s32 %s1066_s27, %s1139_s30  ;;  %p91_p5 = scmp.ne.s32.totalorder %s1062_s26, %s1058_s1 }
  0x1b   : > { %p79_p6 = scmp.eq.s32.totalorder %s78_s7, 0  ;;  %p92_p7 = scmp.eq.s32.totalorder %s1135_s28, 1 }
  0x1c   : > { %p97_p8 = scmp.ne.s32.totalorder %s1058_s1, %s1054_s0  ;;  %p98_p9 = scmp.eq.s32.totalorder %s759_s29, 1 }
  0x1d   : > { %s1150_s8 = scalar_select %p79_p6, %s1062_s26, %s81_s6  }
  0x1e   : > { %p1152_p10 = por %p92_p7, %p91_p5  ;;  %p1156_p11 = por %p98_p9, %p97_p8 }
  0x1f   : > { %1480 = sst [smem:[#allocation18_spill]] %s1150_s8  ;;  %p760_p12 = scmp.ge.s32.totalorder %s1066_s27, 1 }
  0x20   : > { %s1482_s10 = scalar_select %p1156_p11, 1, 0 }
  0x21   : > { %p131_p13 = scmp.lt.s32.totalorder %s1066_s27, 3  ;;  %p1476_p0 = scmp.eq.s32.totalorder %s1135_s28, 0 }
  0x22   : > { %s1070_s12 = smov [#allocation5]   ;;  %s1071_s15 = smov [#allocation8]  }
  0x23   : > { %p1163_p1 = pnand %p760_p12, %p131_p13  ;;  %s143_s13 = sshll.u32 %s1070_s12, 4  ;;  %s144_s13 = int_to_ptr.vmem [resolvable:$true] %s143_s13 }
  0x24   : > { %s156_s16 = sshll.u32 %s1071_s15, 4  ;;  %s925_s17 = scalar_lea.vmem %s144_s13, 8064  ;;  %s157_s16 = int_to_ptr.vmem [resolvable:$true] %s156_s16 }
  0x25   : > { %p803_p2 = pneg %p1163_p1  ;;  %p926_p5 = scmp.ne.s32.totalorder %s144_s13, %s925_s17 }
  0x26   : > { %p933_p8 = scmp.lt.s32.totalorder %s144_s13, %s144_s13  ;;  %p934_p9 = scmp.lt.s32.totalorder %s925_s17, %s925_s17 }
  0x27   : > { %p1171_p3 = pnand %p1476_p0, %p803_p2 }
  0x28   : > { %p935_p12 = por %p934_p9, %p933_p8 }
  0x29   : > { %p916_p4 = pneg %p1171_p3 }
  0x2b   : > { %p928_p6 = pnand %p926_p5, %p916_p4 }
  0x2d   : > { %p929_p7 = pneg %p928_p6 }
  0x2f   : > { %p936_p13 = pnand %p935_p12, %p929_p7 }
  0x31   : > { %939 = shalt.err (!%p936_p13)
}
  0x32   : > { %s1072_s18 = smov 128   ;;  %s1073_s19 = smov 8  }
  0x33   : > { %s1485_s2 = sld [smem:[#allocation19_spill]]  ;;  %s951_s22 = scalar_lea.vmem %s157_s16, 896 }
  0x34   : > { %p952_p2 = scmp.ne.s32.totalorder %s157_s16, %s951_s22  ;;  %p959_p0 = scmp.lt.s32.totalorder %s157_s16, %s157_s16 }
  0x35   : > { %p960_p11 = scmp.lt.s32.totalorder %s951_s22, %s951_s22 }
  0x36   : > { %p954_p5 = pnand %p952_p2, %p916_p4 }
  0x37   : > { %p961_p8 = por %p960_p11, %p959_p0 }
  0x38   : > { %p955_p6 = pneg %p954_p5 }
  0x39   : > { %806 = dma.hbm_to_vmem [thread:$0]  (!%p1171_p3), %s1485_s2, 8064, %s144_s13, [#allocation6], %s1072_s18, %s1072_s18, %s1073_s19  }
  0x3a   : > { %p962_p7 = pnand %p961_p8, %p955_p6 }
  0x3c   : > { %965 = shalt.err (!%p962_p7)
}
  0x3d   : > { %s1486_s3 = sld [smem:[#allocation20_spill]]  ;;  %p1487_p9 = scmp.eq.s32.totalorder (!%p1163_p1), %s1135_s28, 0 }
  0x3f   : > { %172 = sbr.rel (%p1163_p1) target bundleno = 230 (0xe6), region = 28 }
  0x43   : > { %809 = dma.hbm_to_vmem [thread:$0]  (!%p1171_p3), %s1486_s3, 896, %s157_s16, [#allocation9], %s1072_s18, %s1072_s18, %s1073_s19  }
  0x44   : > { %1037 = dma.done.wait (%p1487_p9), [#allocation6], 8064   ;;  %p1488_p4 = pmov %p1487_p9 }
  0x46   : > { %1039 = vsyncadd (%p1488_p4), [#allocation6], 4294959232  ;;  %p1489_p12 = pmov %p1488_p4 }
  0x47   : > { %p1490_p11 = pmov %p1488_p4 }
  0x48   : > { %1041 = dma.done.wait (%p1489_p12), [#allocation9], 896  }
  0x49   : > { %1043 = vsyncadd (%p1490_p11), [#allocation9], 4294966400  ;;  %s1204_s25 = sand.u32 1, %s1058_s1   ;;  %s1207_s29 = sshll.u32 %s1135_s28, 5 }
  0x4a   : > { %s1477_s6 = sshll.u32 %s1204_s25, 6  ;;  %s203_s7 = sld [smem:[#allocation3 + %s1207_s29]] }
  0x4b   : > { %s204_s11 = sld [smem:[#allocation4 + %s1207_s29]]  ;;  %s211_s12 = sadd.s32 1, %s1207_s29 }
  0x4c   : > { %s220_s13 = sadd.s32 2, %s1207_s29  ;;  %s212_s14 = sld [smem:[#allocation3 + %s211_s12]] }
  0x4d   : > { %s229_s15 = sadd.s32 3, %s1207_s29  ;;  %s213_s16 = sld [smem:[#allocation4 + %s211_s12]] }
  0x4e   : > { %s238_s17 = sadd.s32 4, %s1207_s29  ;;  %s221_s18 = sld [smem:[#allocation3 + %s220_s13]] }
  0x4f   : > { %s247_s19 = sadd.s32 5, %s1207_s29  ;;  %s222_s20 = sld [smem:[#allocation4 + %s220_s13]] }
  0x50   : > { %s205_s21 = scalar_lea.vmem [#allocation5], %s203_s7  ;;  %s230_s22 = sld [smem:[#allocation3 + %s229_s15]] }
  0x51   : > { %v206_v0 = vld [vmem:[%s205_s21] sm:$0x1]  ;;  %s1219_s23 = scalar_lea.vmem [#allocation10], %s1477_s6  ;;  %s208_s24 = scalar_lea.vmem [#allocation8], %s204_s11 }
  0x52   : > { %207 = vst [vmem:[%s1219_s23] sm:$0x1] %v206_v0  ;;  %v209_v1 = vld [vmem:[%s208_s24] sm:$0x1]  ;;  %s231_s2 = sld [smem:[#allocation4 + %s229_s15]]  ;;  %s256_s12 = sadd.s32 6, %s1207_s29 }
  0x53   : > { %210 = vst [vmem:[%s1219_s23 + $0x8] sm:$0x1] %v209_v1  ;;  %s239_s3 = sld [smem:[#allocation3 + %s238_s17]]  ;;  %s214_s13 = scalar_lea.vmem [#allocation5], %s212_s14 }
  0x54   : > { %v215_v2 = vld [vmem:[%s214_s13] sm:$0x1]  ;;  %s240_s7 = sld [smem:[#allocation4 + %s238_s17]]  ;;  %s217_s21 = scalar_lea.vmem [#allocation8], %s213_s16 }
  0x55   : > { %216 = vst [vmem:[%s1219_s23 + $0x1] sm:$0x1] %v215_v2  ;;  %v218_v3 = vld [vmem:[%s217_s21] sm:$0x1]  ;;  %s248_s6 = sld [smem:[#allocation3 + %s247_s19]]  ;;  %s223_s8 = scalar_lea.vmem [#allocation5], %s221_s18 }
  0x56   : > { %219 = vst [vmem:[%s1219_s23 + $0x9] sm:$0x1] %v218_v3  ;;  %v224_v4 = vld [vmem:[%s223_s8] sm:$0x1]  ;;  %s249_s11 = sld [smem:[#allocation4 + %s247_s19]]  ;;  %s226_s15 = scalar_lea.vmem [#allocation8], %s222_s20 }
  0x57   : > { %225 = vst [vmem:[%s1219_s23 + $0x2] sm:$0x1] %v224_v4  ;;  %v227_v5 = vld [vmem:[%s226_s15] sm:$0x1]  ;;  %s257_s24 = sld [smem:[#allocation3 + %s256_s12]]  ;;  %s232_s14 = scalar_lea.vmem [#allocation5], %s230_s22 }
  0x58   : > { %228 = vst [vmem:[%s1219_s23 + $0xa] sm:$0x1] %v227_v5  ;;  %v233_v6 = vld [vmem:[%s232_s14] sm:$0x1]  ;;  %s258_s17 = sld [smem:[#allocation4 + %s256_s12]]  ;;  %s235_s16 = scalar_lea.vmem [#allocation8], %s231_s2 }
  0x59   : > { %234 = vst [vmem:[%s1219_s23 + $0x3] sm:$0x1] %v233_v6  ;;  %v236_v7 = vld [vmem:[%s235_s16] sm:$0x1]  ;;  %s265_s13 = sadd.s32 7, %s1207_s29  ;;  %s241_s8 = scalar_lea.vmem [#allocation5], %s239_s3 }
  0x5a   : > { %237 = vst [vmem:[%s1219_s23 + $0xb] sm:$0x1] %v236_v7  ;;  %v242_v8 = vld [vmem:[%s241_s8] sm:$0x1]  ;;  %s266_s18 = sld [smem:[#allocation3 + %s265_s13]]  ;;  %s244_s19 = scalar_lea.vmem [#allocation8], %s240_s7 }
  0x5b   : > { %243 = vst [vmem:[%s1219_s23 + $0x4] sm:$0x1] %v242_v8  ;;  %v245_v9 = vld [vmem:[%s244_s19] sm:$0x1]  ;;  %s267_s20 = sld [smem:[#allocation4 + %s265_s13]]  ;;  %s250_s22 = scalar_lea.vmem [#allocation5], %s248_s6 }
  0x5c   : > { %246 = vst [vmem:[%s1219_s23 + $0xc] sm:$0x1] %v245_v9  ;;  %v251_v10 = vld [vmem:[%s250_s22] sm:$0x1]  ;;  %s274_s12 = sadd.s32 8, %s1207_s29  ;;  %s253_s2 = scalar_lea.vmem [#allocation8], %s249_s11 }
  0x5d   : > { %252 = vst [vmem:[%s1219_s23 + $0x5] sm:$0x1] %v251_v10  ;;  %v254_v11 = vld [vmem:[%s253_s2] sm:$0x1]  ;;  %s275_s21 = sld [smem:[#allocation3 + %s274_s12]]  ;;  %s259_s3 = scalar_lea.vmem [#allocation5], %s257_s24 }
  0x5e   : > { %255 = vst [vmem:[%s1219_s23 + $0xd] sm:$0x1] %v254_v11  ;;  %v260_v12 = vld [vmem:[%s259_s3] sm:$0x1]  ;;  %s276_s15 = sld [smem:[#allocation4 + %s274_s12]]  ;;  %s262_s7 = scalar_lea.vmem [#allocation8], %s258_s17 }
  0x5f   : > { %261 = vst [vmem:[%s1219_s23 + $0x6] sm:$0x1] %v260_v12  ;;  %v263_v13 = vld [vmem:[%s262_s7] sm:$0x1]  ;;  %s283_s14 = sadd.s32 9, %s1207_s29  ;;  %s292_s16 = sadd.s32 10, %s1207_s29 }
  0x60   : > { %264 = vst [vmem:[%s1219_s23 + $0xe] sm:$0x1] %v263_v13  ;;  %s284_s6 = sld [smem:[#allocation3 + %s283_s14]]  ;;  %s268_s13 = scalar_lea.vmem [#allocation5], %s266_s18 }
  0x61   : > { %v269_v14 = vld [vmem:[%s268_s13] sm:$0x1]  ;;  %s285_s11 = sld [smem:[#allocation4 + %s283_s14]]  ;;  %s271_s8 = scalar_lea.vmem [#allocation8], %s267_s20 }
  0x62   : > { %270 = vst [vmem:[%s1219_s23 + $0x7] sm:$0x1] %v269_v14  ;;  %v272_v15 = vld [vmem:[%s271_s8] sm:$0x1]  ;;  %s293_s24 = sld [smem:[#allocation3 + %s292_s16]]  ;;  %s301_s19 = sadd.s32 11, %s1207_s29 }
  0x63   : > { %273 = vst [vmem:[%s1219_s23 + $0xf] sm:$0x1] %v272_v15  ;;  %s294_s22 = sld [smem:[#allocation4 + %s292_s16]]  ;;  %s277_s17 = scalar_lea.vmem [#allocation5], %s275_s21 }
  0x64   : > { %v278_v16 = vld [vmem:[%s277_s17] sm:$0x1]  ;;  %s302_s12 = sld [smem:[#allocation3 + %s301_s19]]  ;;  %s280_s2 = scalar_lea.vmem [#allocation8], %s276_s15 }
  0x65   : > { %279 = vst [vmem:[%s1219_s23 + $0x10] sm:$0x1] %v278_v16  ;;  %v281_v17 = vld [vmem:[%s280_s2] sm:$0x1]  ;;  %s303_s18 = sld [smem:[#allocation4 + %s301_s19]]  ;;  %s310_s3 = sadd.s32 12, %s1207_s29 }
  0x66   : > { %282 = vst [vmem:[%s1219_s23 + $0x18] sm:$0x1] %v281_v17  ;;  %s311_s20 = sld [smem:[#allocation3 + %s310_s3]]  ;;  %s286_s7 = scalar_lea.vmem [#allocation5], %s284_s6 }
  0x67   : > { %v287_v18 = vld [vmem:[%s286_s7] sm:$0x1]  ;;  %s312_s14 = sld [smem:[#allocation4 + %s310_s3]]  ;;  %s289_s16 = scalar_lea.vmem [#allocation8], %s285_s11 }
  0x68   : > { %288 = vst [vmem:[%s1219_s23 + $0x11] sm:$0x1] %v287_v18  ;;  %v290_v19 = vld [vmem:[%s289_s16] sm:$0x1]  ;;  %s319_s21 = sadd.s32 13, %s1207_s29  ;;  %s295_s15 = scalar_lea.vmem [#allocation5], %s293_s24 }
  0x69   : > { %291 = vst [vmem:[%s1219_s23 + $0x19] sm:$0x1] %v290_v19  ;;  %v296_v20 = vld [vmem:[%s295_s15] sm:$0x1]  ;;  %s320_s13 = sld [smem:[#allocation3 + %s319_s21]]  ;;  %s298_s8 = scalar_lea.vmem [#allocation8], %s294_s22 }
  0x6a   : > { %297 = vst [vmem:[%s1219_s23 + $0x12] sm:$0x1] %v296_v20  ;;  %v299_v21 = vld [vmem:[%s298_s8] sm:$0x1]  ;;  %s304_s6 = scalar_lea.vmem [#allocation5], %s302_s12  ;;  %s321_s19 = sld [smem:[#allocation4 + %s319_s21]] }
  0x6b   : > { %300 = vst [vmem:[%s1219_s23 + $0x1a] sm:$0x1] %v299_v21  ;;  %v305_v22 = vld [vmem:[%s304_s6] sm:$0x1]  ;;  %s307_s11 = scalar_lea.vmem [#allocation8], %s303_s18  ;;  %s328_s17 = sadd.s32 14, %s1207_s29 }
  0x6c   : > { %306 = vst [vmem:[%s1219_s23 + $0x13] sm:$0x1] %v305_v22  ;;  %v308_v23 = vld [vmem:[%s307_s11] sm:$0x1]  ;;  %v490_v24 = vld [vmem:[%s1219_s23] sm:$0xff]  ;;  %s313_s24 = scalar_lea.vmem [#allocation5], %s311_s20 }
  0x6d   : > { %309 = vst [vmem:[%s1219_s23 + $0x1b] sm:$0x1] %v308_v23  ;;  %v314_v25 = vld [vmem:[%s313_s24] sm:$0x1]  ;;  %s329_s2 = sld [smem:[#allocation3 + %s328_s17]]  ;;  %v491_v26 = vld [vmem:[%s1219_s23 + $0x8] sm:$0xff] }
  0x6e   : > { %315 = vst [vmem:[%s1219_s23 + $0x14] sm:$0x1] %v314_v25  ;;  %s316_s22 = scalar_lea.vmem [#allocation8], %s312_s14  ;;  %s330_s12 = sld [smem:[#allocation4 + %s328_s17]]  ;;  %v769_v28 = vmul.f32 -1.442695, %v490_v24 }
  0x6f   : > { %v317_v27 = vld [vmem:[%s316_s22] sm:$0x1]  ;;  %s337_s3 = sadd.s32 15, %s1207_s29  ;;  %s322_s18 = scalar_lea.vmem [#allocation5], %s320_s13  ;;  %v770_v30 = vmul.f32 -1.442695, %v491_v26 }
  0x70   : > { %318 = vst [vmem:[%s1219_s23 + $0x1c] sm:$0x1] %v317_v27  ;;  %s338_s7 = sld [smem:[#allocation3 + %s337_s3]]  ;;  %v323_v29 = vld [vmem:[%s322_s18] sm:$0x1]  ;;  %s346_s21 = sadd.s32 16, %s1207_s29  ;;  %862 = vpow2.f32 %v769_v28 }
  0x71   : > { %s339_s16 = sld [smem:[#allocation4 + %s337_s3]]  ;;  %324 = vst [vmem:[%s1219_s23 + $0x15] sm:$0x1] %v323_v29  ;;  %s325_s15 = scalar_lea.vmem [#allocation8], %s321_s19  ;;  %864 = vpow2.f32 %v770_v30 }
  0x72   : > { %s347_s20 = sld [smem:[#allocation3 + %s346_s21]]  ;;  %v326_v31 = vld [vmem:[%s325_s15] sm:$0x1]  ;;  %s355_s8 = sadd.s32 17, %s1207_s29 }
  0x73   : > { %s348_s14 = sld [smem:[#allocation4 + %s346_s21]]  ;;  %327 = vst [vmem:[%s1219_s23 + $0x1d] sm:$0x1] %v326_v31  ;;  %s331_s11 = scalar_lea.vmem [#allocation5], %s329_s2 }
  0x74   : > { %s356_s6 = sld [smem:[#allocation3 + %s355_s8]]  ;;  %v332_v32 = vld [vmem:[%s331_s11] sm:$0x1]  ;;  %s334_s17 = scalar_lea.vmem [#allocation8], %s330_s12 }
  0x75   : > { %s357_s13 = sld [smem:[#allocation4 + %s355_s8]]  ;;  %333 = vst [vmem:[%s1219_s23 + $0x16] sm:$0x1] %v332_v32  ;;  %v335_v33 = vld [vmem:[%s334_s17] sm:$0x1]  ;;  %s364_s24 = sadd.s32 18, %s1207_s29 }
  0x76   : > { %336 = vst [vmem:[%s1219_s23 + $0x1e] sm:$0x1] %v335_v33  ;;  %s340_s19 = scalar_lea.vmem [#allocation5], %s338_s7  ;;  %s365_s22 = sld [smem:[#allocation3 + %s364_s24]] }
  0x77   : > { %v341_v34 = vld [vmem:[%s340_s19] sm:$0x1]  ;;  %s343_s3 = scalar_lea.vmem [#allocation8], %s339_s16  ;;  %s366_s2 = sld [smem:[#allocation4 + %s364_s24]] }
  0x78   : > { %342 = vst [vmem:[%s1219_s23 + $0x17] sm:$0x1] %v341_v34  ;;  %v344_v35 = vld [vmem:[%s343_s3] sm:$0x1]  ;;  %s349_s18 = scalar_lea.vmem [#allocation5], %s347_s20  ;;  %s373_s21 = sadd.s32 19, %s1207_s29 }
  0x79   : > { %345 = vst [vmem:[%s1219_s23 + $0x1f] sm:$0x1] %v344_v35  ;;  %v350_v36 = vld [vmem:[%s349_s18] sm:$0x1]  ;;  %s352_s12 = scalar_lea.vmem [#allocation8], %s348_s14  ;;  %s374_s15 = sld [smem:[#allocation3 + %s373_s21]] }
  0x7a   : > { %351 = vst [vmem:[%s1219_s23 + $0x20] sm:$0x1] %v350_v36  ;;  %v353_v37 = vld [vmem:[%s352_s12] sm:$0x1]  ;;  %s358_s7 = scalar_lea.vmem [#allocation5], %s356_s6  ;;  %s1271_s8 = sld [smem:[#allocation4 + %s373_s21]] }
  0x7b   : > { %354 = vst [vmem:[%s1219_s23 + $0x28] sm:$0x1] %v353_v37  ;;  %v359_v38 = vld [vmem:[%s358_s7] sm:$0x1]  ;;  %s361_s16 = scalar_lea.vmem [#allocation8], %s357_s13  ;;  %s382_s20 = sadd.s32 20, %s1207_s29 }
  0x7c   : > { %360 = vst [vmem:[%s1219_s23 + $0x21] sm:$0x1] %v359_v38  ;;  %v362_v39 = vld [vmem:[%s361_s16] sm:$0x1]  ;;  %s391_s11 = sadd.s32 21, %s1207_s29  ;;  %s1277_s17 = sld [smem:[#allocation3 + %s382_s20]] }
  0x7d   : > { %363 = vst [vmem:[%s1219_s23 + $0x29] sm:$0x1] %v362_v39  ;;  %s367_s14 = scalar_lea.vmem [#allocation5], %s365_s22  ;;  %s1279_s24 = sld [smem:[#allocation4 + %s382_s20]]  ;;  %v863_v47 = vpop.eup %862 }
  0x7e   : > { %v368_v40 = vld [vmem:[%s367_s14] sm:$0x1]  ;;  %s370_s6 = scalar_lea.vmem [#allocation8], %s366_s2  ;;  %s1283_s19 = sld [smem:[#allocation3 + %s391_s11]]  ;;  %v865_v49 = vpop.eup %864  ;;  %v522_v52 = vadd.f32 1.0, %v863_v47 }
  0x7f   : > { %v492_v41 = vld [vmem:[%s1219_s23 + $0x10] sm:$0xff]  ;;  %369 = vst [vmem:[%s1219_s23 + $0x22] sm:$0x1] %v368_v40  ;;  %s400_s13 = sadd.s32 22, %s1207_s29  ;;  %s1288_s3 = sld [smem:[#allocation4 + %s391_s11]]  ;;  %v523_v54 = vadd.f32 1.0, %v865_v49 }
  0x80   : > { %v371_v42 = vld [vmem:[%s370_s6] sm:$0x1]  ;;  %v771_v43 = vmul.f32 -1.442695, %v492_v41  ;;  %v493_v44 = vld [vmem:[%s1219_s23 + $0x18] sm:$0xff]  ;;  %s376_s22 = scalar_lea.vmem [#allocation5], %s374_s15 }
  0x81   : > { %372 = vst [vmem:[%s1219_s23 + $0x2a] sm:$0x1] %v371_v42  ;;  %v772_v45 = vmul.f32 -1.442695, %v493_v44  ;;  %v377_v46 = vld [vmem:[%s376_s22] sm:$0x1] }
  0x82   : > { %s1290_s18 = sld [smem:[#allocation3 + %s400_s13]]  ;;  %866 = vpow2.f32 %v771_v43  ;;  %378 = vst [vmem:[%s1219_s23 + $0x23] sm:$0x1] %v377_v46  ;;  %s379_s2 = scalar_lea.vmem [#allocation8], %s1271_s8 }
  0x83   : > { %v380_v48 = vld [vmem:[%s379_s2] sm:$0x1]  ;;  %s1294_s21 = sld [smem:[#allocation4 + %s400_s13]]  ;;  %s409_s12 = sadd.s32 23, %s1207_s29  ;;  %868 = vpow2.f32 %v772_v45 }
  0x84   : > { %381 = vst [vmem:[%s1219_s23 + $0x2b] sm:$0x1] %v380_v48  ;;  %s1298_s15 = sld [smem:[#allocation3 + %s409_s12]]  ;;  %s385_s7 = scalar_lea.vmem [#allocation5], %s1277_s17  ;;  %870 = vrcp.f32 %v522_v52 }
  0x85   : > { %v386_v50 = vld [vmem:[%s385_s7] sm:$0x1]  ;;  %s1301_s16 = sld [smem:[#allocation4 + %s409_s12]]  ;;  %s388_s8 = scalar_lea.vmem [#allocation8], %s1279_s24  ;;  %872 = vrcp.f32 %v523_v54 }
  0x86   : > { %387 = vst [vmem:[%s1219_s23 + $0x24] sm:$0x1] %v386_v50  ;;  %v389_v51 = vld [vmem:[%s388_s8] sm:$0x1]  ;;  %s418_s20 = sadd.s32 24, %s1207_s29  ;;  %s394_s11 = scalar_lea.vmem [#allocation5], %s1283_s19 }
  0x87   : > { %390 = vst [vmem:[%s1219_s23 + $0x2c] sm:$0x1] %v389_v51  ;;  %v395_v53 = vld [vmem:[%s394_s11] sm:$0x1]  ;;  %s419_s14 = sld [smem:[#allocation3 + %s418_s20]]  ;;  %s397_s17 = scalar_lea.vmem [#allocation8], %s1288_s3 }
  0x88   : > { %396 = vst [vmem:[%s1219_s23 + $0x25] sm:$0x1] %v395_v53  ;;  %v398_v55 = vld [vmem:[%s397_s17] sm:$0x1]  ;;  %s420_s6 = sld [smem:[#allocation4 + %s418_s20]]  ;;  %s403_s24 = scalar_lea.vmem [#allocation5], %s1290_s18 }
  0x89   : > { %399 = vst [vmem:[%s1219_s23 + $0x2d] sm:$0x1] %v398_v55  ;;  %v404_v56 = vld [vmem:[%s403_s24] sm:$0x1]  ;;  %s427_s13 = sadd.s32 25, %s1207_s29  ;;  %s406_s19 = scalar_lea.vmem [#allocation8], %s1294_s21 }
  0x8a   : > { %405 = vst [vmem:[%s1219_s23 + $0x26] sm:$0x1] %v404_v56  ;;  %v407_v57 = vld [vmem:[%s406_s19] sm:$0x1]  ;;  %s428_s22 = sld [smem:[#allocation3 + %s427_s13]]  ;;  %s412_s2 = scalar_lea.vmem [#allocation5], %s1298_s15 }
  0x8b   : > { %408 = vst [vmem:[%s1219_s23 + $0x2e] sm:$0x1] %v407_v57  ;;  %v413_v58 = vld [vmem:[%s412_s2] sm:$0x1]  ;;  %s429_s3 = sld [smem:[#allocation4 + %s427_s13]]  ;;  %s415_s18 = scalar_lea.vmem [#allocation8], %s1301_s16 }
  0x8c   : > { %414 = vst [vmem:[%s1219_s23 + $0x27] sm:$0x1] %v413_v58  ;;  %v416_v59 = vld [vmem:[%s415_s18] sm:$0x1]  ;;  %s436_s12 = sadd.s32 26, %s1207_s29  ;;  %s445_s7 = sadd.s32 27, %s1207_s29 }
  0x8d   : > { %417 = vst [vmem:[%s1219_s23 + $0x2f] sm:$0x1] %v416_v59  ;;  %s1322_s8 = sld [smem:[#allocation3 + %s436_s12]]  ;;  %s421_s21 = scalar_lea.vmem [#allocation5], %s419_s14 }
  0x8e   : > { %v422_v60 = vld [vmem:[%s421_s21] sm:$0x1]  ;;  %s1324_s20 = sld [smem:[#allocation4 + %s436_s12]]  ;;  %s424_s15 = scalar_lea.vmem [#allocation8], %s420_s6 }
  0x8f   : > { %423 = vst [vmem:[%s1219_s23 + $0x30] sm:$0x1] %v422_v60  ;;  %v425_v61 = vld [vmem:[%s424_s15] sm:$0x1]  ;;  %s1327_s11 = sld [smem:[#allocation3 + %s445_s7]]  ;;  %s454_s17 = sadd.s32 28, %s1207_s29  ;;  %v867_v62 = vpop.eup %866 }
  0x90   : > { %426 = vst [vmem:[%s1219_s23 + $0x38] sm:$0x1] %v425_v61  ;;  %s1331_s16 = sld [smem:[#allocation4 + %s445_s7]]  ;;  %v869_v63 = vpop.eup %868  ;;  %s430_s14 = scalar_lea.vmem [#allocation5], %s428_s22  ;;  %v524_v1 = vadd.f32 1.0, %v867_v62 }
  0x91   : > { %v431_v0 = vld [vmem:[%s430_s14] sm:$0x1]  ;;  %s1333_s24 = sld [smem:[#allocation3 + %s454_s17]]  ;;  %s433_s6 = scalar_lea.vmem [#allocation8], %s429_s3  ;;  %v525_v3 = vadd.f32 1.0, %v869_v63  ;;  %v871_v11 = vpop.eup %870 }
  0x92   : > { %432 = vst [vmem:[%s1219_s23 + $0x31] sm:$0x1] %v431_v0  ;;  %v434_v2 = vld [vmem:[%s433_s6] sm:$0x1]  ;;  %s1336_s13 = sld [smem:[#allocation4 + %s454_s17]]  ;;  %s463_s19 = sadd.s32 29, %s1207_s29  ;;  %874 = vrcp.f32 %v524_v1  ;;  %v873_v13 = vpop.eup %872 }
  0x93   : > { %v494_v4 = vld [vmem:[%s1219_s23 + $0x20] sm:$0xff]  ;;  %435 = vst [vmem:[%s1219_s23 + $0x39] sm:$0x1] %v434_v2  ;;  %s1341_s2 = sld [smem:[#allocation3 + %s463_s19]]  ;;  %s439_s22 = scalar_lea.vmem [#allocation5], %s1322_s8  ;;  %876 = vrcp.f32 %v525_v3 }
  0x94   : > { %v773_v5 = vmul.f32 -1.442695, %v494_v4  ;;  %v495_v6 = vld [vmem:[%s1219_s23 + $0x28] sm:$0xff]  ;;  %v440_v7 = vld [vmem:[%s439_s22] sm:$0x1]  ;;  %s442_s3 = scalar_lea.vmem [#allocation8], %s1324_s20 }
  0x95   : > { %v774_v8 = vmul.f32 -1.442695, %v495_v6  ;;  %441 = vst [vmem:[%s1219_s23 + $0x32] sm:$0x1] %v440_v7  ;;  %v443_v9 = vld [vmem:[%s442_s3] sm:$0x1] }
  0x96   : > { %s1347_s18 = sld [smem:[#allocation4 + %s463_s19]]  ;;  %878 = vpow2.f32 %v773_v5  ;;  %444 = vst [vmem:[%s1219_s23 + $0x3a] sm:$0x1] %v443_v9  ;;  %s448_s12 = scalar_lea.vmem [#allocation5], %s1327_s11 }
  0x97   : > { %v449_v10 = vld [vmem:[%s448_s12] sm:$0x1]  ;;  %s472_s7 = sadd.s32 30, %s1207_s29  ;;  %880 = vpow2.f32 %v774_v8  ;;  %s451_s8 = scalar_lea.vmem [#allocation8], %s1331_s16 }
  0x98   : > { %450 = vst [vmem:[%s1219_s23 + $0x33] sm:$0x1] %v449_v10  ;;  %v452_v12 = vld [vmem:[%s451_s8] sm:$0x1]  ;;  %s473_s21 = sld [smem:[#allocation3 + %s472_s7]]  ;;  %s457_s20 = scalar_lea.vmem [#allocation5], %s1333_s24 }
  0x99   : > { %453 = vst [vmem:[%s1219_s23 + $0x3b] sm:$0x1] %v452_v12  ;;  %v458_v14 = vld [vmem:[%s457_s20] sm:$0x1]  ;;  %s474_s15 = sld [smem:[#allocation4 + %s472_s7]]  ;;  %s460_s11 = scalar_lea.vmem [#allocation8], %s1336_s13 }
  0x9a   : > { %459 = vst [vmem:[%s1219_s23 + $0x34] sm:$0x1] %v458_v14  ;;  %v461_v15 = vld [vmem:[%s460_s11] sm:$0x1]  ;;  %s481_s17 = sadd.s32 31, %s1207_s29  ;;  %s466_s14 = scalar_lea.vmem [#allocation5], %s1341_s2 }
  0x9b   : > { %462 = vst [vmem:[%s1219_s23 + $0x3c] sm:$0x1] %v461_v15  ;;  %v467_v16 = vld [vmem:[%s466_s14] sm:$0x1]  ;;  %s482_s16 = sld [smem:[#allocation3 + %s481_s17]]  ;;  %s1491_s19 = sshll.u32 %s1204_s25, 6 }
  0x9c   : > { %468 = vst [vmem:[%s1219_s23 + $0x35] sm:$0x1] %v467_v16  ;;  %s483_s6 = sld [smem:[#allocation4 + %s481_s17]]  ;;  %s1364_s24 = scalar_lea.vmem [#allocation11], %s1491_s19 }
  0x9d   : > { %546 = vst [vmem:[%s1364_s24] sm:$0xff] %v871_v11  ;;  %547 = vst [vmem:[%s1364_s24 + $0x8] sm:$0xff] %v873_v13  ;;  %s469_s13 = scalar_lea.vmem [#allocation8], %s1347_s18  ;;  %s788_s2 = sshll.u32 %s1135_s28, 10 }
  0x9e   : > { %v470_v17 = vld [vmem:[%s469_s13] sm:$0x1]  ;;  %s475_s29 = scalar_lea.vmem [#allocation5], %s473_s21  ;;  %s1377_s7 = scalar_lea.hbm %s1473_s4, %s788_s2 }
  0x9f   : > { %471 = vst [vmem:[%s1219_s23 + $0x3d] sm:$0x1] %v470_v17  ;;  %v476_v18 = vld [vmem:[%s475_s29] sm:$0x1]  ;;  %s478_s22 = scalar_lea.vmem [#allocation8], %s474_s15  ;;  %s574_s8 = sshll.u32 %s1219_s23, 4  ;;  %v875_v20 = vpop.eup %874  ;;  %s1381_s8 = int_to_ptr.vmem [resolvable:$true] %s574_s8 }
  0xa0   : > { %477 = vst [vmem:[%s1219_s23 + $0x36] sm:$0x1] %v476_v18  ;;  %v479_v19 = vld [vmem:[%s478_s22] sm:$0x1]  ;;  %v877_v21 = vpop.eup %876  ;;  %548 = vst [vmem:[%s1364_s24 + $0x10] sm:$0xff] %v875_v20  ;;  %s555_s20 = scalar_lea.sflag [#allocation7], %s1204_s25 }
  0xa1   : > { %480 = vst [vmem:[%s1219_s23 + $0x3e] sm:$0x1] %v479_v19  ;;  %s484_s18 = scalar_lea.vmem [#allocation5], %s482_s16  ;;  %549 = vst [vmem:[%s1364_s24 + $0x18] sm:$0xff] %v877_v21  ;;  %s966_s15 = scalar_lea.vmem %s1381_s8, 1024 }
  0xa2   : > { %v485_v22 = vld [vmem:[%s484_s18] sm:$0x1]  ;;  %s487_s21 = scalar_lea.vmem [#allocation8], %s483_s6  ;;  %p967_p0 = scmp.ne.s32.totalorder %s1381_s8, %s966_s15 }
  0xa3   : > { %486 = vst [vmem:[%s1219_s23 + $0x37] sm:$0x1] %v485_v22  ;;  %v488_v23 = vld [vmem:[%s487_s21] sm:$0x1]  ;;  %v879_v24 = vpop.eup %878  ;;  %s1074_s11 = smov [#allocation10]  }
  0xa4   : > { %489 = vst [vmem:[%s1219_s23 + $0x3f] sm:$0x1] %v488_v23  ;;  %v881_v25 = vpop.eup %880  ;;  %v526_v26 = vadd.f32 1.0, %v879_v24  ;;  %p968_p1 = pnand %p967_p0, %p1152_p10  ;;  %s970_s17 = sshll.u32 %s1074_s11, 4  ;;  %s971_s17 = int_to_ptr.vmem [resolvable:$false] %s970_s17 }
  0xa5   : > { %s972_s14 = scalar_lea.vmem %s971_s17, 2048  ;;  %p973_p13 = scmp.lt.s32.totalorder %s1381_s8, %s971_s17 }
  0xa6   : > { %p969_p3 = pneg %p968_p1  ;;  %p974_p2 = scmp.lt.s32.totalorder %s972_s14, %s966_s15 }
  0xa8   : > { %p975_p5 = por %p974_p2, %p973_p13 }
  0xaa   : > { %p976_p6 = pnand %p975_p5, %p969_p3 }
  0xac   : > { %979 = shalt.err (!%p976_p6)
}
  0xad   : > { %s980_s16 = scalar_lea.hbm %s1377_s7, 1024  ;;  %s984_s13 = scalar_lea.hbm %s1473_s4, 2048 }
  0xae   : > { %p981_p8 = scmp.ne.s32.totalorder %s1377_s7, %s980_s16  ;;  %p985_p4 = scmp.lt.s32.totalorder %s1377_s7, %s1473_s4 }
  0xaf   : > { %p986_p12 = scmp.lt.s32.totalorder %s984_s13, %s980_s16 }
  0xb0   : > { %p982_p7 = pnand %p981_p8, %p1152_p10 }
  0xb1   : > { %p987_p11 = por %p986_p12, %p985_p4 }
  0xb2   : > { %p983_p9 = pneg %p982_p7 }
  0xb4   : > { %p988_p0 = pnand %p987_p11, %p983_p9 }
  0xb6   : > { %991 = shalt.err (!%p988_p0)
}
  0xb7   : > { %s1075_s3 = smov 256   ;;  %s1076_s12 = smov 16   ;;  %v527_v27 = vadd.f32 1.0, %v881_v25  ;;  %882 = vrcp.f32 %v526_v26  ;;  %v496_v28 = vld [vmem:[%s1219_s23 + $0x30] sm:$0xff]  ;;  %v497_v30 = vld [vmem:[%s1219_s23 + $0x38] sm:$0xff] }
  0xb8   : > { %799 = dma.vmem_to_hbm [thread:$0]  (%p1152_p10), %s1381_s8, 1024, %s1377_s7, %s555_s20, %s1075_s3, %s1075_s3, %s1076_s12   ;;  %v775_v29 = vmul.f32 -1.442695, %v496_v28  ;;  %v776_v31 = vmul.f32 -1.442695, %v497_v30 }
  0xb9   : > { %884 = vrcp.f32 %v527_v27  ;;  %s591_s7 = sshll.u32 %s1364_s24, 4  ;;  %s1425_s18 = scalar_lea.hbm %s1474_s5, %s788_s2  ;;  %s1418_s7 = int_to_ptr.vmem [resolvable:$true] %s591_s7 }
  0xba   : > { %886 = vpow2.f32 %v775_v29  ;;  %s560_s21 = scalar_lea.sflag [#allocation12], %s1204_s25  ;;  %s992_s20 = scalar_lea.vmem %s1418_s7, 1024 }
  0xbb   : > { %888 = vpow2.f32 %v776_v31  ;;  %p993_p1 = scmp.ne.s32.totalorder %s1418_s7, %s992_s20  ;;  %s1077_s15 = smov [#allocation11]  }
  0xbc   : > { %s996_s11 = sshll.u32 %s1077_s15, 4  ;;  %s997_s11 = int_to_ptr.vmem [resolvable:$false] %s996_s11 }
  0xbd   : > { %p994_p3 = pnand %p993_p1, %p1152_p10  ;;  %s998_s17 = scalar_lea.vmem %s997_s11, 2048 }
  0xbe   : > { %p999_p2 = scmp.lt.s32.totalorder %s1418_s7, %s997_s11  ;;  %p1000_p5 = scmp.lt.s32.totalorder %s998_s17, %s992_s20 }
  0xbf   : > { %p995_p13 = pneg %p994_p3 }
  0xc0   : > { %p1001_p6 = por %p1000_p5, %p999_p2 }
  0xc2   : > { %p1002_p8 = pnand %p1001_p6, %p995_p13 }
  0xc4   : > { %v883_v32 = vpop.eup %882 }
  0xc5   : > { %550 = vst [vmem:[%s1364_s24 + $0x20] sm:$0xff] %v883_v32 }
  0xc6   : > { %v885_v33 = vpop.eup %884 }
  0xc7   : > { %551 = vst [vmem:[%s1364_s24 + $0x28] sm:$0xff] %v885_v33  ;;  %v887_v34 = vpop.eup %886 }
  0xc8   : > { %v889_v35 = vpop.eup %888  ;;  %v528_v36 = vadd.f32 1.0, %v887_v34 }
  0xc9   : > { %v529_v37 = vadd.f32 1.0, %v889_v35 }
  0xca   : > { %890 = vrcp.f32 %v528_v36 }
  0xcb   : > { %892 = vrcp.f32 %v529_v37 }
  0xd7   : > { %v891_v38 = vpop.eup %890 }
  0xd8   : > { %v893_v39 = vpop.eup %892  ;;  %552 = vst [vmem:[%s1364_s24 + $0x30] sm:$0xff] %v891_v38 }
  0xd9   : > { %553 = vst [vmem:[%s1364_s24 + $0x38] sm:$0xff] %v893_v39 }
  0xda   : > { %1005 = shalt.err (!%p1002_p8)
}
  0xdb   : > { %s1006_s28 = scalar_lea.hbm %s1425_s18, 1024  ;;  %s1010_s2 = scalar_lea.hbm %s1474_s5, 2048 }
  0xdc   : > { %p1007_p7 = scmp.ne.s32.totalorder %s1425_s18, %s1006_s28  ;;  %p1011_p12 = scmp.lt.s32.totalorder %s1425_s18, %s1474_s5 }
  0xdd   : > { %p1012_p11 = scmp.lt.s32.totalorder %s1010_s2, %s1006_s28 }
  0xde   : > { %p1008_p9 = pnand %p1007_p7, %p1152_p10 }
  0xdf   : > { %p1013_p0 = por %p1012_p11, %p1011_p12 }
  0xe0   : > { %p1009_p4 = pneg %p1008_p9 }
  0xe2   : > { %p1014_p1 = pnand %p1013_p0, %p1009_p4 }
  0xe4   : > { %1017 = shalt.err (!%p1014_p1)
}
  0xe5   : > { %800 = dma.vmem_to_hbm [thread:$0]  (%p1152_p10), %s1418_s7, 1024, %s1425_s18, %s560_s21, %s1075_s3, %s1075_s3, %s1076_s12  }
  0xe6 PF: > { %p821_p3 = scmp.ge.s32.totalorder %s1066_s27, 2  ;;  %s606_s6 = sand.u32 1, %s1054_s0  }
  0xe7   : > { %p1492_p13 = scmp.ne.s32.totalorder %s1482_s10, 0  ;;  %s607_s19 = scalar_lea.sflag [#allocation7], %s606_s6 }
  0xe9   : > { %p811_p2 = pnand %p821_p3, %p1492_p13 }
  0xeb   : > { %p812_p5 = pneg %p811_p2 }
  0xed   : > { %1045 = dma.done.wait (%p812_p5), %s607_s19, 1024  }
  0xee   : > { %1047 = vsyncadd (%p812_p5), %s607_s19, 4294966272  ;;  %s616_s13 = scalar_lea.sflag [#allocation12], %s606_s6 }
  0xef   : > { %1049 = dma.done.wait (%p812_p5), %s616_s13, 1024  }
  0xf0   : > { %1051 = vsyncadd (%p812_p5), %s616_s13, 4294966272  ;;  %s1493_s9 = sld [smem:[#allocation18_spill]]  ;;  %p29_p10 = scmp.ge.s32.totalorder %s1139_s30, 4  }
  0xf1   : > { %s1494_s0 = smov %s1058_s1  ;;  %s1495_s1 = smov %s1062_s26 }
  0xf2   : > { %s1497_s27 = smov %s1139_s30  ;;  %31 = sbr.rel (!%p29_p10) target bundleno = 24 (0x18), region = 150 }
  0xf6   : > { %s1496_s26 = smov %s1493_s9 }
  0xf7   :  { %621 = vsyncpa [#allocation6], 1 }
  0xf8   :  { %623 = vsyncpa [#allocation6 + $0x1], 1 }
  0xf9   :  { %624 = vsyncpa [#allocation9], 1 }
  0xfa   :  { %625 = vsyncpa [#allocation7], 1 }
  0xfb   :  { %627 = vsyncpa [#allocation7 + $0x1], 1 }
  0xfc   :  { %628 = vsyncpa [#allocation12], 1 }
  0xfd   :  { %630 = vsyncpa [#allocation12 + $0x1], 1 }

</bundles_post_ra>
